<compile_context>
chip_gen: v5e
topology: v5e:2x2
jax: 0.10.0
libtpu: 0.0.40
codegen_flags: <defaults>
</compile_context>

<pallas_src>
import functools

import jax
import jax.numpy as jnp
from jax.experimental import pallas as pl
from jax.experimental.pallas import tpu as pltpu


NEG_SLOPE = 0.01      # PyTorch F.leaky_relu default negative_slope
LANE = 128            # lane-dense output width granularity
MAX_TM = 512          # max batch-tile rows


def _round_up(x, m):
    return ((x + m - 1) // m) * m


def _leaky_relu(x):
    return jnp.where(x > 0, x, NEG_SLOPE * x)


def mlp_kernel(x_ref,
               w1_ref, b1_ref,
               w2_ref, b2_ref,
               w3_ref, b3_ref,
               w4_ref, b4_ref,
               w5_ref, b5_ref,
               o_ref,
               *, out_dim, apply_softmax):
    """One batch tile of the 5-layer MLP.

    f32 x tile is cast to bf16 in-kernel; bf16 MXU matmuls with f32
    accumulation / bias / activation; bf16 output tile.
    """

    def linear(h_bf16, w_ref, b_ref):
        return (jnp.dot(h_bf16, w_ref[...],
                        preferred_element_type=jnp.float32)
                + b_ref[...])                       # bias is f32

    h = x_ref[...].astype(jnp.bfloat16)             # f32 -> bf16 on the VPU
    h = _leaky_relu(linear(h, w1_ref, b1_ref))      # -> f32
    h = _leaky_relu(linear(h.astype(jnp.bfloat16), w2_ref, b2_ref))
    h = _leaky_relu(linear(h.astype(jnp.bfloat16), w3_ref, b3_ref))
    h = _leaky_relu(linear(h.astype(jnp.bfloat16), w4_ref, b4_ref))
    h = linear(h.astype(jnp.bfloat16), w5_ref, b5_ref)   # fc5: no activation

    if apply_softmax:
        # Fused Net.predict epilogue (mask the padded output lanes).
        col = jax.lax.broadcasted_iota(jnp.int32, h.shape, 1)
        h = jnp.where(col < out_dim, h, jnp.finfo(jnp.float32).min)
        h = h - jnp.max(h, axis=-1, keepdims=True)
        e = jnp.exp(h)                              # EUP slot
        h = e / jnp.sum(e, axis=-1, keepdims=True)  # exact denom (negligible)

    o_ref[...] = h.astype(o_ref.dtype)


def _choose_tm(batch):
    """Batch tile: big enough to amortize per-step overhead, but keep >=2
    grid steps where possible so v7x's second TensorCore is not idle."""
    rows = _round_up(max(batch, 1), 8)
    tm = min(MAX_TM, rows)
    if rows // tm < 2 and tm > 8:
        tm = max(8, _round_up(tm // 2, 8))
    return tm


@functools.partial(jax.jit, static_argnames=("out_dim", "apply_softmax"))
def _net_call(x, ws, bs, *, out_dim, apply_softmax=False):
    """x: [B, C, H, W] (NCHW, like PyTorch). Returns [B, out_dim] f32."""
    B = x.shape[0]
    out_pad = ws[-1].shape[1]                       # already lane-padded

    # --- glue: x.view(B, -1), pad batch to the tile (kept in f32) ---
    x_flat = x.reshape(B, -1)
    tm = _choose_tm(B)
    b_pad = _round_up(B, tm)
    if b_pad != B:
        x_flat = jnp.pad(x_flat, ((0, b_pad - B), (0, 0)))

    in_dim = x_flat.shape[1]
    grid = (b_pad // tm,)

    # x / out tiles move with the grid; weights & biases are VMEM-resident
    # (index_map always returns block (0, 0) -> no re-DMA across steps).
    x_spec = pl.BlockSpec((tm, in_dim), lambda i: (i, 0))
    o_spec = pl.BlockSpec((tm, out_pad), lambda i: (i, 0))

    def resident(arr):
        return pl.BlockSpec(arr.shape, lambda i: (0, 0))

    in_specs = [x_spec]
    operands = [x_flat]
    for w, b in zip(ws, bs):
        in_specs += [resident(w), resident(b)]
        operands += [w, b]

    out = pl.pallas_call(
        functools.partial(mlp_kernel, out_dim=out_dim,
                          apply_softmax=apply_softmax),
        out_shape=jax.ShapeDtypeStruct((b_pad, out_pad), jnp.bfloat16),
        grid=grid,
        in_specs=in_specs,
        out_specs=o_spec,
        compiler_params=pltpu.CompilerParams(
            dimension_semantics=("parallel",),      # megacore split on v7x
            vmem_limit_bytes=32 * 1024 * 1024),     # headroom on v5e default
    )(*operands)

    # Tiny slice + f32 upcast for downstream consumers.
    return out[:B, :out_dim].astype(jnp.float32)


def prepare_params(params):
    """One-time parameter prep (hoisted out of the per-call path):
    bf16 weight cast, f32 biases, fc5 zero-padded to a 128-lane output."""
    (w1, b1), (w2, b2), (w3, b3), (w4, b4), (w5, b5) = params
    out_dim = int(w5.shape[1])
    out_pad = _round_up(out_dim, LANE)
    w5p = jnp.pad(w5, ((0, 0), (0, out_pad - out_dim)))
    b5p = jnp.pad(b5, ((0, 0), (0, out_pad - out_dim)))
    ws = tuple(w.astype(jnp.bfloat16) for w in (w1, w2, w3, w4, w5p))
    bs = tuple(b.astype(jnp.float32) for b in (b1, b2, b3, b4, b5p))
    return ws, bs, out_dim


def net_forward(x, prepped):
    """Equivalent of Net.forward: logits, no softmax."""
    ws, bs, out_dim = prepped
    return _net_call(x, ws, bs, out_dim=out_dim, apply_softmax=False)


def net_predict(x, prepped):
    """Equivalent of Net.predict: softmax fused into the kernel epilogue."""
    ws, bs, out_dim = prepped
    return _net_call(x, ws, bs, out_dim=out_dim, apply_softmax=True)


def init_params(key, input_dim, hidden_dim, output_dim):
    """Deterministic init mimicking nn.Linear (uniform +-1/sqrt(fan_in)).

    Weights are stored transposed as [in, out]; biases as [1, out].
    """
    dims = [
        (input_dim, 16 * hidden_dim),        # fc1
        (16 * hidden_dim, 16 * hidden_dim),  # fc2
        (16 * hidden_dim, 8 * hidden_dim),   # fc3
        (8 * hidden_dim, hidden_dim),        # fc4
        (hidden_dim, output_dim),            # fc5
    ]
    params = []
    for (fan_in, fan_out) in dims:
        key, kw, kb = jax.random.split(key, 3)
        bound = 1.0 / (fan_in ** 0.5)
        w = jax.random.uniform(kw, (fan_in, fan_out), jnp.float32,
                               minval=-bound, maxval=bound)
        b = jax.random.uniform(kb, (1, fan_out), jnp.float32,
                               minval=-bound, maxval=bound)
        params.append((w, b))
    return params


def reference_forward(x, params, apply_softmax=False):
    """Plain-JAX reference with matching bf16 matmul inputs / f32 accum."""
    h = x.reshape(x.shape[0], -1).astype(jnp.bfloat16)
    for i, (w, b) in enumerate(params):
        h = (jnp.dot(h, w.astype(jnp.bfloat16),
                     preferred_element_type=jnp.float32)
             + b.astype(jnp.float32))
        if i < len(params) - 1:
            h = _leaky_relu(h).astype(jnp.bfloat16)
    if apply_softmax:
        h = jax.nn.softmax(h, axis=-1)
    return h


if __name__ == "__main__":
    # Small shapes consistent with the module: NCHW image batch,
    # input_dim = C*H*W = 4*4*4 = 64, hidden_dim = 32, output_dim = 10.
    B, C, H, W = 2, 4, 4, 4
    input_dim = C * H * W
    hidden_dim = 32
    output_dim = 10

    key = jax.random.PRNGKey(0)
    key, kx = jax.random.split(key)
    x = jax.random.normal(kx, (B, C, H, W), jnp.float32)
    params = init_params(key, input_dim, hidden_dim, output_dim)
    prepped = prepare_params(params)      # one-time weight prep (hoisted)

    # forward() — logits
    logits = jax.block_until_ready(net_forward(x, prepped))
    ref_logits = reference_forward(x, params)
    assert logits.shape == (B, output_dim), logits.shape
    assert jnp.allclose(logits, ref_logits, atol=2e-2, rtol=2e-2), (
        float(jnp.max(jnp.abs(logits - ref_logits))))

    # predict() — fused softmax epilogue
    probs = jax.block_until_ready(net_predict(x, prepped))
    ref_probs = reference_forward(x, params, apply_softmax=True)
    assert probs.shape == (B, output_dim), probs.shape
    assert jnp.allclose(probs, ref_probs, atol=2e-2, rtol=2e-2), (
        float(jnp.max(jnp.abs(probs - ref_probs))))
    assert jnp.allclose(jnp.sum(probs, axis=-1), 1.0, atol=2e-2)

    # TODO(synk): backward pass / optimizer step of the lesson script is
    # intentionally out of scope (inference kernel only).
    print("KERNEL_OK")
</pallas_src>

<mosaic_0001>
module attributes {stable_mosaic.version = 11 : i64} {
  func.func @mlp_kernel(%arg0: i32, %arg1: memref<8x64xf32, #tpu.memory_space<vmem>>, %arg2: memref<64x512xbf16, #tpu.memory_space<vmem>>, %arg3: memref<1x512xf32, #tpu.memory_space<vmem>>, %arg4: memref<512x512xbf16, #tpu.memory_space<vmem>>, %arg5: memref<1x512xf32, #tpu.memory_space<vmem>>, %arg6: memref<512x256xbf16, #tpu.memory_space<vmem>>, %arg7: memref<1x256xf32, #tpu.memory_space<vmem>>, %arg8: memref<256x32xbf16, #tpu.memory_space<vmem>>, %arg9: memref<1x32xf32, #tpu.memory_space<vmem>>, %arg10: memref<32x128xbf16, #tpu.memory_space<vmem>>, %arg11: memref<1x128xf32, #tpu.memory_space<vmem>>, %arg12: memref<8x128xbf16, #tpu.memory_space<vmem>>) attributes {dimension_semantics = [#tpu.dimension_semantics<parallel>], iteration_bounds = array<i64: 1>, scalar_prefetch = 0 : i64, scratch_operands = 0 : i64, tpu.core_type = #tpu.core_type<tc>, window_params = [{transform_indices = @transform_0, window_bounds = array<i64: 8, 64>}, {pipeline_mode = #tpu.pipeline_mode<synchronous>, transform_indices = @transform_1, window_bounds = array<i64: 64, 512>}, {pipeline_mode = #tpu.pipeline_mode<synchronous>, transform_indices = @transform_2, window_bounds = array<i64: 1, 512>}, {pipeline_mode = #tpu.pipeline_mode<synchronous>, transform_indices = @transform_3, window_bounds = array<i64: 512, 512>}, {pipeline_mode = #tpu.pipeline_mode<synchronous>, transform_indices = @transform_4, window_bounds = array<i64: 1, 512>}, {pipeline_mode = #tpu.pipeline_mode<synchronous>, transform_indices = @transform_5, window_bounds = array<i64: 512, 256>}, {pipeline_mode = #tpu.pipeline_mode<synchronous>, transform_indices = @transform_6, window_bounds = array<i64: 1, 256>}, {pipeline_mode = #tpu.pipeline_mode<synchronous>, transform_indices = @transform_7, window_bounds = array<i64: 256, 32>}, {pipeline_mode = #tpu.pipeline_mode<synchronous>, transform_indices = @transform_8, window_bounds = array<i64: 1, 32>}, {pipeline_mode = #tpu.pipeline_mode<synchronous>, transform_indices = @transform_9, window_bounds = array<i64: 32, 128>}, {pipeline_mode = #tpu.pipeline_mode<synchronous>, transform_indices = @transform_10, window_bounds = array<i64: 1, 128>}, {transform_indices = @transform_11, window_bounds = array<i64: 8, 128>}]} {
    %c0 = arith.constant 0 : index
    %c0_0 = arith.constant 0 : index
    %0 = vector.load %arg1[%c0, %c0_0] : memref<8x64xf32, #tpu.memory_space<vmem>>, vector<8x64xf32>
    %1 = arith.truncf %0 : vector<8x64xf32> to vector<8x64xbf16>
    %c0_1 = arith.constant 0 : index
    %c0_2 = arith.constant 0 : index
    %2 = vector.load %arg2[%c0_1, %c0_2] : memref<64x512xbf16, #tpu.memory_space<vmem>>, vector<64x512xbf16>
    %cst = arith.constant dense<0.000000e+00> : vector<8x512xf32>
    %3 = tpu.matmul %1, %2, %cst {dimension_numbers = #tpu.dot_dimension_numbers<[1], [0], [0], [1], [0, 0, 1, 1], [], []>} : vector<8x64xbf16>, vector<64x512xbf16>, vector<8x512xf32> -> vector<8x512xf32>
    %c0_3 = arith.constant 0 : index
    %c0_4 = arith.constant 0 : index
    %4 = vector.load %arg3[%c0_3, %c0_4] : memref<1x512xf32, #tpu.memory_space<vmem>>, vector<1x512xf32>
    %5 = vector.broadcast %4 : vector<1x512xf32> to vector<8x512xf32>
    %6 = arith.addf %3, %5 : vector<8x512xf32>
    %cst_5 = arith.constant 0.000000e+00 : f32
    %7 = vector.broadcast %cst_5 : f32 to vector<8x512xf32>
    %8 = arith.cmpf ogt, %6, %7 : vector<8x512xf32>
    %cst_6 = arith.constant 0.00999999977 : f32
    %9 = vector.broadcast %cst_6 : f32 to vector<8x512xf32>
    %10 = arith.mulf %9, %6 : vector<8x512xf32>
    %11 = arith.select %8, %6, %10 : vector<8x512xi1>, vector<8x512xf32>
    %12 = arith.truncf %11 : vector<8x512xf32> to vector<8x512xbf16>
    %c0_7 = arith.constant 0 : index
    %c0_8 = arith.constant 0 : index
    %13 = vector.load %arg4[%c0_7, %c0_8] : memref<512x512xbf16, #tpu.memory_space<vmem>>, vector<512x512xbf16>
    %cst_9 = arith.constant dense<0.000000e+00> : vector<8x512xf32>
    %14 = tpu.matmul %12, %13, %cst_9 {dimension_numbers = #tpu.dot_dimension_numbers<[1], [0], [0], [1], [0, 0, 1, 1], [], []>} : vector<8x512xbf16>, vector<512x512xbf16>, vector<8x512xf32> -> vector<8x512xf32>
    %c0_10 = arith.constant 0 : index
    %c0_11 = arith.constant 0 : index
    %15 = vector.load %arg5[%c0_10, %c0_11] : memref<1x512xf32, #tpu.memory_space<vmem>>, vector<1x512xf32>
    %16 = vector.broadcast %15 : vector<1x512xf32> to vector<8x512xf32>
    %17 = arith.addf %14, %16 : vector<8x512xf32>
    %cst_12 = arith.constant 0.000000e+00 : f32
    %18 = vector.broadcast %cst_12 : f32 to vector<8x512xf32>
    %19 = arith.cmpf ogt, %17, %18 : vector<8x512xf32>
    %cst_13 = arith.constant 0.00999999977 : f32
    %20 = vector.broadcast %cst_13 : f32 to vector<8x512xf32>
    %21 = arith.mulf %20, %17 : vector<8x512xf32>
    %22 = arith.select %19, %17, %21 : vector<8x512xi1>, vector<8x512xf32>
    %23 = arith.truncf %22 : vector<8x512xf32> to vector<8x512xbf16>
    %c0_14 = arith.constant 0 : index
    %c0_15 = arith.constant 0 : index
    %24 = vector.load %arg6[%c0_14, %c0_15] : memref<512x256xbf16, #tpu.memory_space<vmem>>, vector<512x256xbf16>
    %cst_16 = arith.constant dense<0.000000e+00> : vector<8x256xf32>
    %25 = tpu.matmul %23, %24, %cst_16 {dimension_numbers = #tpu.dot_dimension_numbers<[1], [0], [0], [1], [0, 0, 1, 1], [], []>} : vector<8x512xbf16>, vector<512x256xbf16>, vector<8x256xf32> -> vector<8x256xf32>
    %c0_17 = arith.constant 0 : index
    %c0_18 = arith.constant 0 : index
    %26 = vector.load %arg7[%c0_17, %c0_18] : memref<1x256xf32, #tpu.memory_space<vmem>>, vector<1x256xf32>
    %27 = vector.broadcast %26 : vector<1x256xf32> to vector<8x256xf32>
    %28 = arith.addf %25, %27 : vector<8x256xf32>
    %cst_19 = arith.constant 0.000000e+00 : f32
    %29 = vector.broadcast %cst_19 : f32 to vector<8x256xf32>
    %30 = arith.cmpf ogt, %28, %29 : vector<8x256xf32>
    %cst_20 = arith.constant 0.00999999977 : f32
    %31 = vector.broadcast %cst_20 : f32 to vector<8x256xf32>
    %32 = arith.mulf %31, %28 : vector<8x256xf32>
    %33 = arith.select %30, %28, %32 : vector<8x256xi1>, vector<8x256xf32>
    %34 = arith.truncf %33 : vector<8x256xf32> to vector<8x256xbf16>
    %c0_21 = arith.constant 0 : index
    %c0_22 = arith.constant 0 : index
    %35 = vector.load %arg8[%c0_21, %c0_22] : memref<256x32xbf16, #tpu.memory_space<vmem>>, vector<256x32xbf16>
    %cst_23 = arith.constant dense<0.000000e+00> : vector<8x32xf32>
    %36 = tpu.matmul %34, %35, %cst_23 {dimension_numbers = #tpu.dot_dimension_numbers<[1], [0], [0], [1], [0, 0, 1, 1], [], []>} : vector<8x256xbf16>, vector<256x32xbf16>, vector<8x32xf32> -> vector<8x32xf32>
    %c0_24 = arith.constant 0 : index
    %c0_25 = arith.constant 0 : index
    %37 = vector.load %arg9[%c0_24, %c0_25] : memref<1x32xf32, #tpu.memory_space<vmem>>, vector<1x32xf32>
    %38 = vector.broadcast %37 : vector<1x32xf32> to vector<8x32xf32>
    %39 = arith.addf %36, %38 : vector<8x32xf32>
    %cst_26 = arith.constant 0.000000e+00 : f32
    %40 = vector.broadcast %cst_26 : f32 to vector<8x32xf32>
    %41 = arith.cmpf ogt, %39, %40 : vector<8x32xf32>
    %cst_27 = arith.constant 0.00999999977 : f32
    %42 = vector.broadcast %cst_27 : f32 to vector<8x32xf32>
    %43 = arith.mulf %42, %39 : vector<8x32xf32>
    %44 = arith.select %41, %39, %43 : vector<8x32xi1>, vector<8x32xf32>
    %45 = arith.truncf %44 : vector<8x32xf32> to vector<8x32xbf16>
    %c0_28 = arith.constant 0 : index
    %c0_29 = arith.constant 0 : index
    %46 = vector.load %arg10[%c0_28, %c0_29] : memref<32x128xbf16, #tpu.memory_space<vmem>>, vector<32x128xbf16>
    %cst_30 = arith.constant dense<0.000000e+00> : vector<8x128xf32>
    %47 = tpu.matmul %45, %46, %cst_30 {dimension_numbers = #tpu.dot_dimension_numbers<[1], [0], [0], [1], [0, 0, 1, 1], [], []>} : vector<8x32xbf16>, vector<32x128xbf16>, vector<8x128xf32> -> vector<8x128xf32>
    %c0_31 = arith.constant 0 : index
    %c0_32 = arith.constant 0 : index
    %48 = vector.load %arg11[%c0_31, %c0_32] : memref<1x128xf32, #tpu.memory_space<vmem>>, vector<1x128xf32>
    %49 = vector.broadcast %48 : vector<1x128xf32> to vector<8x128xf32>
    %50 = arith.addf %47, %49 : vector<8x128xf32>
    %51 = arith.truncf %50 : vector<8x128xf32> to vector<8x128xbf16>
    %c0_33 = arith.constant 0 : index
    %c0_34 = arith.constant 0 : index
    %52 = vector.load %arg12[%c0_33, %c0_34] : memref<8x128xbf16, #tpu.memory_space<vmem>>, vector<8x128xbf16>
    tpu.vector_store %arg12[%c0_33, %c0_34], %51 {strides = array<i32>} : memref<8x128xbf16, #tpu.memory_space<vmem>>, vector<8x128xbf16>,
    return
  }
  func.func @transform_0(%arg0: i32) -> (i32, i32) {
    %c0_i32 = arith.constant 0 : i32
    %c0_i32_0 = arith.constant 0 : i32
    return %arg0, %c0_i32 : i32, i32
  }
  func.func @transform_1(%arg0: i32) -> (i32, i32) {
    %c0_i32 = arith.constant 0 : i32
    %c0_i32_0 = arith.constant 0 : i32
    %c0_i32_1 = arith.constant 0 : i32
    return %c0_i32, %c0_i32_0 : i32, i32
  }
  func.func @transform_2(%arg0: i32) -> (i32, i32) {
    %c0_i32 = arith.constant 0 : i32
    %c0_i32_0 = arith.constant 0 : i32
    %c0_i32_1 = arith.constant 0 : i32
    return %c0_i32, %c0_i32_0 : i32, i32
  }
  func.func @transform_3(%arg0: i32) -> (i32, i32) {
    %c0_i32 = arith.constant 0 : i32
    %c0_i32_0 = arith.constant 0 : i32
    %c0_i32_1 = arith.constant 0 : i32
    return %c0_i32, %c0_i32_0 : i32, i32
  }
  func.func @transform_4(%arg0: i32) -> (i32, i32) {
    %c0_i32 = arith.constant 0 : i32
    %c0_i32_0 = arith.constant 0 : i32
    %c0_i32_1 = arith.constant 0 : i32
    return %c0_i32, %c0_i32_0 : i32, i32
  }
  func.func @transform_5(%arg0: i32) -> (i32, i32) {
    %c0_i32 = arith.constant 0 : i32
    %c0_i32_0 = arith.constant 0 : i32
    %c0_i32_1 = arith.constant 0 : i32
    return %c0_i32, %c0_i32_0 : i32, i32
  }
  func.func @transform_6(%arg0: i32) -> (i32, i32) {
    %c0_i32 = arith.constant 0 : i32
    %c0_i32_0 = arith.constant 0 : i32
    %c0_i32_1 = arith.constant 0 : i32
    return %c0_i32, %c0_i32_0 : i32, i32
  }
  func.func @transform_7(%arg0: i32) -> (i32, i32) {
    %c0_i32 = arith.constant 0 : i32
    %c0_i32_0 = arith.constant 0 : i32
    %c0_i32_1 = arith.constant 0 : i32
    return %c0_i32, %c0_i32_0 : i32, i32
  }
  func.func @transform_8(%arg0: i32) -> (i32, i32) {
    %c0_i32 = arith.constant 0 : i32
    %c0_i32_0 = arith.constant 0 : i32
    %c0_i32_1 = arith.constant 0 : i32
    return %c0_i32, %c0_i32_0 : i32, i32
  }
  func.func @transform_9(%arg0: i32) -> (i32, i32) {
    %c0_i32 = arith.constant 0 : i32
    %c0_i32_0 = arith.constant 0 : i32
    %c0_i32_1 = arith.constant 0 : i32
    return %c0_i32, %c0_i32_0 : i32, i32
  }
  func.func @transform_10(%arg0: i32) -> (i32, i32) {
    %c0_i32 = arith.constant 0 : i32
    %c0_i32_0 = arith.constant 0 : i32
    %c0_i32_1 = arith.constant 0 : i32
    return %c0_i32, %c0_i32_0 : i32, i32
  }
  func.func @transform_11(%arg0: i32) -> (i32, i32) {
    %c0_i32 = arith.constant 0 : i32
    %c0_i32_0 = arith.constant 0 : i32
    return %arg0, %c0_i32 : i32, i32
  }
}

</mosaic_0001>

<bundles_post_ra>
// kernel: _net_call.1
= control target key start
LH: loop header
LB: loop body
LE: loop exit
PB: predicated region body
PF: predicated region fallthrough
CT: control target
= control target key end

     0   :  { %16 = vsyncpa [#allocation3], 0  ;;  %s3455_s0 = inlined_call_operand.vmem [shape: f32[8,64], index: 0, kind: input, shape index: {}]   ;;  %s3456_s1 = inlined_call_operand.vmem [shape: bf16[64,512], index: 1, kind: input, shape index: {}]   ;;  %s3457_s2 = inlined_call_operand.vmem [shape: f32[1,512], index: 2, kind: input, shape index: {}]   ;;  %s3458_s3 = inlined_call_operand.hbm [shape: bf16[512,512], index: 3, kind: input, shape index: {}]   ;;  %s3459_s4 = inlined_call_operand.vmem [shape: f32[1,512], index: 4, kind: input, shape index: {}]   ;;  %s3460_s5 = inlined_call_operand.hbm [shape: bf16[512,256], index: 5, kind: input, shape index: {}]   ;;  %s3461_s6 = inlined_call_operand.vmem [shape: f32[1,256], index: 6, kind: input, shape index: {}]   ;;  %s3462_s7 = inlined_call_operand.vmem [shape: bf16[256,32], index: 7, kind: input, shape index: {}]   ;;  %s3463_s8 = inlined_call_operand.vmem [shape: f32[1,32], index: 8, kind: input, shape index: {}]   ;;  %s3464_s9 = inlined_call_operand.vmem [shape: bf16[32,128], index: 9, kind: input, shape index: {}]   ;;  %s3465_s10 = inlined_call_operand.vmem [shape: f32[1,128], index: 10, kind: input, shape index: {}]   ;;  %s3466_s11 = inlined_call_operand.vmem [shape: bf16[8,128], index: 11, kind: output, shape index: {}]  }
   0x1   :  { %s28_s19 = sshll.u32 %s3458_s3, 4  ;;  %s29_s19 = int_to_ptr.hbm [resolvable:$true] %s28_s19 }
   0x2   :  { %17 = vsyncpa [#allocation5], 0  ;;  %s3157_s20 = smov [#allocation2]   ;;  %s43_s24 = sshll.u32 %s3460_s5, 4  ;;  %s44_s24 = int_to_ptr.hbm [resolvable:$true] %s43_s24 }
   0x3   :  { %s30_s21 = sshll.u32 %s3157_s20, 4  ;;  %s3158_s25 = smov 256   ;;  %s31_s21 = int_to_ptr.vmem [resolvable:$true] %s30_s21 }
   0x4   :  { %s3159_s26 = smov 16   ;;  %s3160_s27 = smov [#allocation4]  }
   0x5   :  { %36 = dma.hbm_to_vmem [thread:$0]  %s29_s19, 16384, %s31_s21, [#allocation3], %s3158_s25, %s3158_s25, %s3159_s26  }
   0x6   :  { %s45_s28 = sshll.u32 %s3160_s27, 4  ;;  %s3161_s29 = smov 128   ;;  %s46_s28 = int_to_ptr.vmem [resolvable:$true] %s45_s28 }
   0x7   :  { %s3162_s30 = smov 8  }
   0x8   :  { %51 = dma.hbm_to_vmem [thread:$0]  %s44_s24, 8192, %s46_s28, [#allocation5], %s3161_s29, %s3161_s29, %s3162_s30  }
   0x9   :  { %3153 = dma.done.wait [#allocation3], 16384  }
   0xa   :  { %3154 = vsyncadd [#allocation3], 4294950912 }
   0xb   :  { %3155 = dma.done.wait [#allocation5], 8192  }
   0xc   :  { %3156 = vsyncadd [#allocation5], 4294959104  ;;  %v2012_v0 = vld [vmem:[%s3456_s1 + $0x60] sm:$0xf]  ;;  %v2885_v1 = vld [vmem:[%s3456_s1 + $0x6c] sm:$0xf0] }
   0xd   :  { %v2883_v2 = vld [vmem:[%s3456_s1 + $0x64] sm:$0xf]  ;;  %v2013_v3 = vor.u32 %v2885_v1, %v2012_v0  ;;  %v2014_v4 = vld [vmem:[%s3456_s1 + $0x70] sm:$0xf0]  ;;  %v2020_v5 = vld [vmem:[%s3456_s1 + $0x68] sm:$0xf] }
   0xe   :  { %v2886_v6 = vld [vmem:[%s3456_s1 + $0x74] sm:$0xf0]  ;;  %v2017_v7 = vor.u32 %v2883_v2, %v2014_v4  ;;  %v1996_v9 = vld [vmem:[%s3456_s1 + $0x40] sm:$0xf]  ;;  %v2881_v10 = vld [vmem:[%s3456_s1 + $0x4c] sm:$0xf0] }
   0xf   :  { %v2021_v8 = vor.u32 %v2886_v6, %v2020_v5  ;;  %v2879_v11 = vld [vmem:[%s3456_s1 + $0x44] sm:$0xf]  ;;  %187 = vmatpush.bf16.msra.mxu3 %v2013_v3  ;;  %v1997_v12 = vor.u32 %v2881_v10, %v1996_v9  ;;  %v1998_v13 = vld [vmem:[%s3456_s1 + $0x50] sm:$0xf0]  ;;  %v2004_v14 = vld [vmem:[%s3456_s1 + $0x48] sm:$0xf] }
  0x10   :  { %v2882_v15 = vld [vmem:[%s3456_s1 + $0x54] sm:$0xf0]  ;;  %200 = vmatpush.bf16.msra.mxu1 %v2017_v7  ;;  %v2001_v16 = vor.u32 %v2879_v11, %v1998_v13  ;;  %v1980_v18 = vld [vmem:[%s3456_s1 + $0x20] sm:$0xf]  ;;  %v2877_v19 = vld [vmem:[%s3456_s1 + $0x2c] sm:$0xf0] }
  0x11   :  { %213 = vmatpush.bf16.msra.mxu2 %v2021_v8  ;;  %v2005_v17 = vor.u32 %v2882_v15, %v2004_v14  ;;  %v2875_v20 = vld [vmem:[%s3456_s1 + $0x24] sm:$0xf]  ;;  %v1982_v21 = vld [vmem:[%s3456_s1 + $0x30] sm:$0xf0]  ;;  %v1988_v22 = vld [vmem:[%s3456_s1 + $0x28] sm:$0xf]  ;;  %v1981_v24 = vor.u32 %v2877_v19, %v1980_v18 }
  0x12   :  { %v2878_v23 = vld [vmem:[%s3456_s1 + $0x34] sm:$0xf0]  ;;  %v1985_v25 = vor.u32 %v2875_v20, %v1982_v21  ;;  %v1964_v27 = vld [vmem:[%s3456_s1] sm:$0xf]  ;;  %v2873_v28 = vld [vmem:[%s3456_s1 + $0xc] sm:$0xf0] }
  0x13   :  { %188 = vmatpush.bf16.msra.mxu3 %v1997_v12  ;;  %v1989_v26 = vor.u32 %v2878_v23, %v1988_v22  ;;  %v2871_v29 = vld [vmem:[%s3456_s1 + $0x4] sm:$0xf]  ;;  %v1966_v30 = vld [vmem:[%s3456_s1 + $0x10] sm:$0xf0]  ;;  %v1972_v31 = vld [vmem:[%s3456_s1 + $0x8] sm:$0xf]  ;;  %v1965_v35 = vor.u32 %v2873_v28, %v1964_v27 }
  0x14   :  { %201 = vmatpush.bf16.msra.mxu1 %v2001_v16  ;;  %v2874_v32 = vld [vmem:[%s3456_s1 + $0x14] sm:$0xf0]  ;;  %v2884_v33 = vld [vmem:[%s3456_s1 + $0x6c] sm:$0xf]  ;;  %v2022_v34 = vld [vmem:[%s3456_s1 + $0x78] sm:$0xf0]  ;;  %v1969_v39 = vor.u32 %v2871_v29, %v1966_v30 }
  0x15   :  { %214 = vmatpush.bf16.msra.mxu2 %v2005_v17  ;;  %v71_v36 = vld [vmem:[%s3455_s0] sm:$0xff]  ;;  %v2949_v38 = vld [vmem:[#allocation2 + $0x1ec] sm:$0xf0]  ;;  %v1973_v40 = vor.u32 %v2874_v32, %v1972_v31  ;;  %v2880_v41 = vld [vmem:[%s3456_s1 + $0x4c] sm:$0xf]  ;;  %v2025_v45 = vor.u32 %v2884_v33, %v2022_v34  ;;  %vm179_vm0 = vcmask 523264  }
  0x16   :  { %v2272_v37 = vld [vmem:[#allocation2 + $0x1e0] sm:$0xf]  ;;  %v2006_v42 = vld [vmem:[%s3456_s1 + $0x58] sm:$0xf0]  ;;  %v2917_v44 = vld [vmem:[#allocation2 + $0xec] sm:$0xf0]  ;;  %v3316_v51 = vpack.c.bf16 %v71_v36, %v71_v36 }
  0x17   :  { %189 = vmatpush.bf16.msra.mxu3 %v1981_v24  ;;  %v2144_v43 = vld [vmem:[#allocation2 + $0xe0] sm:$0xf]  ;;  %v2273_v46 = vor.u32 %v2949_v38, %v2272_v37  ;;  %v2981_v50 = vld [vmem:[#allocation2 + $0x2ec] sm:$0xf0]  ;;  %v2009_v59 = vor.u32 %v2880_v41, %v2006_v42  ;;  %v2876_v60 = vld [vmem:[%s3456_s1 + $0x2c] sm:$0xf] }
  0x18   :  { %202 = vmatpush.bf16.msra.mxu1 %v1985_v25  ;;  %v2256_v47 = vld [vmem:[#allocation2 + $0x1c0] sm:$0xf]  ;;  %v2145_v48 = vor.u32 %v2917_v44, %v2144_v43  ;;  %v2945_v52 = vld [vmem:[#allocation2 + $0x1cc] sm:$0xf0]  ;;  %v1990_v0 = vld [vmem:[%s3456_s1 + $0x38] sm:$0xf0] }
  0x19   :  { %215 = vmatpush.bf16.msra.mxu2 %v1989_v26  ;;  %v2400_v49 = vld [vmem:[#allocation2 + $0x2e0] sm:$0xf]  ;;  %v2913_v55 = vld [vmem:[#allocation2 + $0xcc] sm:$0xf0]  ;;  %v2257_v61 = vor.u32 %v2945_v52, %v2256_v47  ;;  %v2872_v6 = vld [vmem:[%s3456_s1 + $0xc] sm:$0xf]  ;;  %v1993_v8 = vor.u32 %v2876_v60, %v1990_v0 }
  0x1a   :  { %v2401_v53 = vor.u32 %v2981_v50, %v2400_v49  ;;  %v2128_v54 = vld [vmem:[#allocation2 + $0xc0] sm:$0xf]  ;;  %1029 = vmatpush.bf16.msra.mxu0 %v2145_v48  ;;  %v2977_v57 = vld [vmem:[#allocation2 + $0x2cc] sm:$0xf0]  ;;  %v1974_v9 = vld [vmem:[%s3456_s1 + $0x18] sm:$0xf0] }
  0x1b   :  { %190 = vmatpush.bf16.msra.mxu3 %v1965_v35  ;;  %v2384_v56 = vld [vmem:[#allocation2 + $0x2c0] sm:$0xf]  ;;  %v2129_v58 = vor.u32 %v2913_v55, %v2128_v54  ;;  %v2909_v63 = vld [vmem:[#allocation2 + $0xac] sm:$0xf0]  ;;  %v1977_v21 = vor.u32 %v2872_v6, %v1974_v9  ;;  %v2402_v9 = vld [vmem:[#allocation2 + $0x2f0] sm:$0xf0] }
  0x1c   :  { %203 = vmatpush.bf16.msra.mxu1 %v1969_v39  ;;  %v2112_v62 = vld [vmem:[#allocation2 + $0xa0] sm:$0xf]  ;;  %v2941_v2 = vld [vmem:[#allocation2 + $0x1ac] sm:$0xf0]  ;;  %v2385_v3 = vor.u32 %v2977_v57, %v2384_v56  ;;  %vm1937_vm12 = vcmask 261120  }
  0x1d   :  { %216 = vmatpush.bf16.msra.mxu2 %v1973_v40  ;;  %v2240_v1 = vld [vmem:[#allocation2 + $0x1a0] sm:$0xf]  ;;  %v2973_v5 = vld [vmem:[#allocation2 + $0x2ac] sm:$0xf0]  ;;  %v2113_v7 = vor.u32 %v2909_v63, %v2112_v62  ;;  %v2947_v62 = vld [vmem:[#allocation2 + $0x1e4] sm:$0xf] }
  0x1e   :  { %2026 = vmatmul.msk.bf16.vlgmr.msra.gmra.mxu3 %vm179_vm0, %v3316_v51  ;;  %v2368_v4 = vld [vmem:[#allocation2 + $0x2a0] sm:$0xf]  ;;  %1030 = vmatpush.bf16.msra.mxu0 %v2129_v58  ;;  %v2241_v10 = vor.u32 %v2941_v2, %v2240_v1  ;;  %v2905_v12 = vld [vmem:[#allocation2 + $0x8c] sm:$0xf0]  ;;  %v2915_v2 = vld [vmem:[#allocation2 + $0xe4] sm:$0xf] }
  0x1f   :  { %226 = vmatpush.bf16.msrb.mxu3 %v2025_v45  ;;  %2027 = vmatmul.msk.bf16.vlgmr.msra.gmra.mxu1 %vm179_vm0, %v3316_v51  ;;  %v2096_v11 = vld [vmem:[#allocation2 + $0x80] sm:$0xf]  ;;  %v2937_v14 = vld [vmem:[#allocation2 + $0x18c] sm:$0xf0]  ;;  %v2369_v15 = vor.u32 %v2973_v5, %v2368_v4 }
  0x20   :  { %1042 = vmatpush.bf16.msrb.mxu1 %v2273_v46  ;;  %2028 = vmatmul.msk.bf16.vlgmr.msra.gmra.mxu2 %vm179_vm0, %v3316_v51  ;;  %v2224_v13 = vld [vmem:[#allocation2 + $0x180] sm:$0xf]  ;;  %v2969_v17 = vld [vmem:[#allocation2 + $0x28c] sm:$0xf0]  ;;  %v2097_v20 = vor.u32 %v2905_v12, %v2096_v11 }
  0x21   :  { %1055 = vmatpush.bf16.msrb.mxu2 %v2401_v53  ;;  %v2352_v16 = vld [vmem:[#allocation2 + $0x280] sm:$0xf]  ;;  %v3013_v19 = vld [vmem:[#allocation2 + $0x3ec] sm:$0xf0]  ;;  %v2225_v22 = vor.u32 %v2937_v14, %v2224_v13 }
  0x22   :  { %v2528_v18 = vld [vmem:[#allocation2 + $0x3e0] sm:$0xf]  ;;  %1031 = vmatpush.bf16.msra.mxu0 %v2113_v7  ;;  %v2901_v24 = vld [vmem:[#allocation2 + $0x6c] sm:$0xf0]  ;;  %v2353_v27 = vor.u32 %v2969_v17, %v2352_v16  ;;  %v2979_v7 = vld [vmem:[#allocation2 + $0x2e4] sm:$0xf] }
  0x23   :  { %227 = vmatpush.bf16.msrb.mxu3 %v2009_v59  ;;  %v2080_v23 = vld [vmem:[#allocation2 + $0x60] sm:$0xf]  ;;  %v2933_v26 = vld [vmem:[#allocation2 + $0x16c] sm:$0xf0]  ;;  %v2529_v28 = vor.u32 %v3013_v19, %v2528_v18  ;;  %v2911_v16 = vld [vmem:[#allocation2 + $0xc4] sm:$0xf] }
  0x24   :  { %1043 = vmatpush.bf16.msrb.mxu1 %v2257_v61  ;;  %v2208_v25 = vld [vmem:[#allocation2 + $0x160] sm:$0xf]  ;;  %v2965_v30 = vld [vmem:[#allocation2 + $0x26c] sm:$0xf0]  ;;  %v2081_v31 = vor.u32 %v2901_v24, %v2080_v23  ;;  %v2130_v17 = vld [vmem:[#allocation2 + $0xd0] sm:$0xf0] }
  0x25   :  { %1056 = vmatpush.bf16.msrb.mxu2 %v2385_v3  ;;  %v2336_v29 = vld [vmem:[#allocation2 + $0x260] sm:$0xf]  ;;  %v3009_v33 = vld [vmem:[#allocation2 + $0x3cc] sm:$0xf0]  ;;  %v2209_v34 = vor.u32 %v2933_v26, %v2208_v25  ;;  %v2146_v3 = vld [vmem:[#allocation2 + $0xf0] sm:$0xf0]  ;;  %v2133_v26 = vor.u32 %v2911_v16, %v2130_v17 }
  0x26   :  { %1032 = vmatpush.bf16.msra.mxu0 %v2097_v20  ;;  %v2512_v32 = vld [vmem:[#allocation2 + $0x3c0] sm:$0xf]  ;;  %v2897_v36 = vld [vmem:[#allocation2 + $0x4c] sm:$0xf0]  ;;  %v2337_v39 = vor.u32 %v2965_v30, %v2336_v29  ;;  %v2149_v13 = vor.u32 %v2915_v2, %v2146_v3  ;;  %v2943_v18 = vld [vmem:[#allocation2 + $0x1c4] sm:$0xf]  ;;  %v2405_v20 = vor.u32 %v2979_v7, %v2402_v9 }
  0x27   :  { %228 = vmatpush.bf16.msrb.mxu3 %v1993_v8  ;;  %v2064_v35 = vld [vmem:[#allocation2 + $0x40] sm:$0xf]  ;;  %v2929_v38 = vld [vmem:[#allocation2 + $0x14c] sm:$0xf0]  ;;  %v2513_v42 = vor.u32 %v3009_v33, %v2512_v32  ;;  %v2258_v19 = vld [vmem:[#allocation2 + $0x1d0] sm:$0xf0] }
  0x28   :  { %1044 = vmatpush.bf16.msrb.mxu1 %v2241_v10  ;;  %v2192_v37 = vld [vmem:[#allocation2 + $0x140] sm:$0xf]  ;;  %v2961_v41 = vld [vmem:[#allocation2 + $0x24c] sm:$0xf0]  ;;  %v2065_v43 = vor.u32 %v2897_v36, %v2064_v35  ;;  %v2386_v23 = vld [vmem:[#allocation2 + $0x2d0] sm:$0xf0] }
  0x29   :  { %1057 = vmatpush.bf16.msrb.mxu2 %v2369_v15  ;;  %v2320_v40 = vld [vmem:[#allocation2 + $0x240] sm:$0xf]  ;;  %v3005_v45 = vld [vmem:[#allocation2 + $0x3ac] sm:$0xf0]  ;;  %v2193_v46 = vor.u32 %v2929_v38, %v2192_v37  ;;  %v2114_v29 = vld [vmem:[#allocation2 + $0xb0] sm:$0xf0] }
  0x2a   :  { %1033 = vmatpush.bf16.msra.mxu0 %v2081_v31  ;;  %v2496_v44 = vld [vmem:[#allocation2 + $0x3a0] sm:$0xf]  ;;  %v2893_v48 = vld [vmem:[#allocation2 + $0x2c] sm:$0xf0]  ;;  %v2321_v52 = vor.u32 %v2961_v41, %v2320_v40  ;;  %v2939_v30 = vld [vmem:[#allocation2 + $0x1a4] sm:$0xf] }
  0x2b   :  { %229 = vmatpush.bf16.msrb.mxu3 %v1977_v21  ;;  %v2048_v47 = vld [vmem:[#allocation2 + $0x20] sm:$0xf]  ;;  %v2925_v50 = vld [vmem:[#allocation2 + $0x12c] sm:$0xf0]  ;;  %v2497_v55 = vor.u32 %v3005_v45, %v2496_v44  ;;  %v2242_v31 = vld [vmem:[#allocation2 + $0x1b0] sm:$0xf0] }
  0x2c   :  { %1045 = vmatpush.bf16.msrb.mxu1 %v2225_v22  ;;  %v2176_v49 = vld [vmem:[#allocation2 + $0x120] sm:$0xf]  ;;  %v2957_v54 = vld [vmem:[#allocation2 + $0x22c] sm:$0xf0]  ;;  %v2049_v58 = vor.u32 %v2893_v48, %v2048_v47  ;;  %v2975_v22 = vld [vmem:[#allocation2 + $0x2c4] sm:$0xf] }
  0x2d   :  { %1058 = vmatpush.bf16.msrb.mxu2 %v2353_v27  ;;  %v2304_v53 = vld [vmem:[#allocation2 + $0x220] sm:$0xf]  ;;  %v2921_v57 = vld [vmem:[#allocation2 + $0x10c] sm:$0xf0]  ;;  %v2177_v61 = vor.u32 %v2925_v50, %v2176_v49  ;;  %v2261_v27 = vor.u32 %v2943_v18, %v2258_v19  ;;  %v2389_v32 = vor.u32 %v2975_v22, %v2386_v23  ;;  %v2370_v35 = vld [vmem:[#allocation2 + $0x2b0] sm:$0xf0] }
  0x2e   :  { %2029 = vmatmul.msk.bf16.vlgmr.msrb.gmra.mxu3 %vm179_vm0, %v3316_v51  ;;  %1034 = vmatpush.bf16.msra.mxu0 %v2065_v43  ;;  %v2160_v56 = vld [vmem:[#allocation2 + $0x100] sm:$0xf]  ;;  %v3001_v60 = vld [vmem:[#allocation2 + $0x38c] sm:$0xf0]  ;;  %v2274_v51 = vld [vmem:[#allocation2 + $0x1f0] sm:$0xf0]  ;;  %v2305_v1 = vor.u32 %v2957_v54, %v2304_v53 }
  0x2f   :  { %1068 = vmatpush.bf16.msra.mxu3 %v2529_v28  ;;  %v2480_v59 = vld [vmem:[#allocation2 + $0x380] sm:$0xf]  ;;  %v2889_v0 = vld [vmem:[#allocation2 + $0xc] sm:$0xf0]  ;;  %v2161_v12 = vor.u32 %v2921_v57, %v2160_v56  ;;  %v2277_v14 = vor.u32 %v2947_v62, %v2274_v51  ;;  %v2907_v28 = vld [vmem:[#allocation2 + $0xa4] sm:$0xf] }
  0x30   :  { %1046 = vmatpush.bf16.msrb.mxu1 %v2209_v34  ;;  %v2032_v63 = vld [vmem:[#allocation2] sm:$0xf]  ;;  %v2953_v5 = vld [vmem:[#allocation2 + $0x20c] sm:$0xf0]  ;;  %v2481_v6 = vor.u32 %v3001_v60, %v2480_v59  ;;  %v2971_v34 = vld [vmem:[#allocation2 + $0x2a4] sm:$0xf]  ;;  %v2117_v38 = vor.u32 %v2907_v28, %v2114_v29 }
  0x31   :  { %1059 = vmatpush.bf16.msrb.mxu2 %v2337_v39  ;;  %v2288_v4 = vld [vmem:[#allocation2 + $0x200] sm:$0xf]  ;;  %v2033_v8 = vor.u32 %v2889_v0, %v2032_v63  ;;  %v2997_v11 = vld [vmem:[#allocation2 + $0x36c] sm:$0xf0]  ;;  %v2245_v39 = vor.u32 %v2939_v30, %v2242_v31  ;;  %v2903_v40 = vld [vmem:[#allocation2 + $0x84] sm:$0xf]  ;;  %v2373_v44 = vor.u32 %v2971_v34, %v2370_v35 }
  0x32   :  { %1035 = vmatpush.bf16.msra.mxu0 %v2049_v58  ;;  %v2464_v10 = vld [vmem:[#allocation2 + $0x360] sm:$0xf]  ;;  %v2289_v15 = vor.u32 %v2953_v5, %v2288_v4  ;;  %v2993_v25 = vld [vmem:[#allocation2 + $0x34c] sm:$0xf0]  ;;  %v2098_v41 = vld [vmem:[#allocation2 + $0x90] sm:$0xf0] }
  0x33   :  { %1069 = vmatpush.bf16.msra.mxu3 %v2513_v42  ;;  %v2465_v21 = vor.u32 %v2997_v11, %v2464_v10  ;;  %v2448_v24 = vld [vmem:[#allocation2 + $0x340] sm:$0xf]  ;;  %v2989_v37 = vld [vmem:[#allocation2 + $0x32c] sm:$0xf0]  ;;  %v2935_v42 = vld [vmem:[#allocation2 + $0x184] sm:$0xf]  ;;  %v2101_v48 = vor.u32 %v2903_v40, %v2098_v41 }
  0x34   :  { %1047 = vmatpush.bf16.msrb.mxu1 %v2193_v46  ;;  %v2449_v33 = vor.u32 %v2993_v25, %v2448_v24  ;;  %v2432_v36 = vld [vmem:[#allocation2 + $0x320] sm:$0xf]  ;;  %v2226_v43 = vld [vmem:[#allocation2 + $0x190] sm:$0xf0]  ;;  %v2967_v46 = vld [vmem:[#allocation2 + $0x284] sm:$0xf] }
  0x35   :  { %1060 = vmatpush.bf16.msrb.mxu2 %v2321_v52  ;;  %v2433_v45 = vor.u32 %v2989_v37, %v2432_v36  ;;  %v2354_v47 = vld [vmem:[#allocation2 + $0x290] sm:$0xf0]  ;;  %v2229_v49 = vor.u32 %v2935_v42, %v2226_v43  ;;  %v2931_v50 = vld [vmem:[#allocation2 + $0x164] sm:$0xf]  ;;  %v2416_v58 = vld [vmem:[#allocation2 + $0x300] sm:$0xf] }
  0x36   :  { %1036 = vmatpush.bf16.msra.mxu0 %v2033_v8  ;;  %v2210_v52 = vld [vmem:[#allocation2 + $0x170] sm:$0xf0]  ;;  %v2357_v53 = vor.u32 %v2967_v46, %v2354_v47  ;;  %v2985_v59 = vld [vmem:[#allocation2 + $0x30c] sm:$0xf0]  ;;  %v2963_v63 = vld [vmem:[#allocation2 + $0x264] sm:$0xf] }
  0x37   :  { %1070 = vmatpush.bf16.msra.mxu3 %v2497_v55  ;;  %v2213_v54 = vor.u32 %v2931_v50, %v2210_v52  ;;  %v2927_v55 = vld [vmem:[#allocation2 + $0x144] sm:$0xf]  ;;  %v2194_v56 = vld [vmem:[#allocation2 + $0x150] sm:$0xf0]  ;;  %v2417_v60 = vor.u32 %v2985_v59, %v2416_v58  ;;  %v3341_v47 = vld [vmem:[%s3457_s2] sm:$0xf] }
  0x38   :  { %1048 = vmatpush.bf16.msrb.mxu1 %v2177_v61  ;;  %v2197_v57 = vor.u32 %v2927_v55, %v2194_v56  ;;  %v2899_v61 = vld [vmem:[#allocation2 + $0x64] sm:$0xf]  ;;  %v2082_v62 = vld [vmem:[#allocation2 + $0x70] sm:$0xf0]  ;;  %v92_v52 = vperm.slane %v3341_v47, 1  ;;  %v91_v55 = vperm.slane %v3341_v47, 0 }
  0x39   :  { %1061 = vmatpush.bf16.msrb.mxu2 %v2305_v1  ;;  %v2085_v0 = vor.u32 %v2899_v61, %v2082_v62  ;;  %v2338_v51 = vld [vmem:[#allocation2 + $0x270] sm:$0xf0]  ;;  %v3011_v1 = vld [vmem:[#allocation2 + $0x3e4] sm:$0xf]  ;;  %v2280_v56 = vld [vmem:[#allocation2 + $0x1e8] sm:$0xf] }
  0x3a   :  { %1081 = vmatpush.bf16.msrb.mxu0 %v2149_v13  ;;  %v2530_v2 = vld [vmem:[#allocation2 + $0x3f0] sm:$0xf0]  ;;  %v2341_v3 = vor.u32 %v2963_v63, %v2338_v51  ;;  %v2923_v5 = vld [vmem:[#allocation2 + $0x124] sm:$0xf]  ;;  %v93_v59 = vperm.slane %v3341_v47, 2 }
  0x3b   :  { %1071 = vmatpush.bf16.msra.mxu3 %v2481_v6  ;;  %v2533_v4 = vor.u32 %v3011_v1, %v2530_v2  ;;  %v2178_v6 = vld [vmem:[#allocation2 + $0x130] sm:$0xf0]  ;;  %v2895_v8 = vld [vmem:[#allocation2 + $0x44] sm:$0xf]  ;;  %v2264_v1 = vld [vmem:[#allocation2 + $0x1c8] sm:$0xf] }
  0x3c   :  { %1049 = vmatpush.bf16.msrb.mxu1 %v2161_v12  ;;  %v2181_v7 = vor.u32 %v2923_v5, %v2178_v6  ;;  %v2066_v9 = vld [vmem:[#allocation2 + $0x50] sm:$0xf0]  ;;  %v2959_v10 = vld [vmem:[#allocation2 + $0x244] sm:$0xf]  ;;  %v2946_v2 = vld [vmem:[#allocation2 + $0x1d4] sm:$0xf0] }
  0x3d   :  { %1062 = vmatpush.bf16.msrb.mxu2 %v2289_v15  ;;  %v2069_v11 = vor.u32 %v2895_v8, %v2066_v9  ;;  %v2322_v12 = vld [vmem:[#allocation2 + $0x250] sm:$0xf0]  ;;  %v3007_v13 = vld [vmem:[#allocation2 + $0x3c4] sm:$0xf]  ;;  %v2918_v5 = vld [vmem:[#allocation2 + $0xf4] sm:$0xf0] }
  0x3e   :  { %1082 = vmatpush.bf16.msrb.mxu0 %v2133_v26  ;;  %v2325_v15 = vor.u32 %v2959_v10, %v2322_v12  ;;  %v2919_v17 = vld [vmem:[#allocation2 + $0x104] sm:$0xf]  ;;  %v2162_v18 = vld [vmem:[#allocation2 + $0x110] sm:$0xf0]  ;;  %v2408_v6 = vld [vmem:[#allocation2 + $0x2e8] sm:$0xf] }
  0x3f   :  { %1072 = vmatpush.bf16.msra.mxu3 %v2465_v21  ;;  %v2165_v19 = vor.u32 %v2919_v17, %v2162_v18  ;;  %v2050_v21 = vld [vmem:[#allocation2 + $0x30] sm:$0xf0]  ;;  %v2955_v22 = vld [vmem:[#allocation2 + $0x224] sm:$0xf]  ;;  %v2982_v8 = vld [vmem:[#allocation2 + $0x2f4] sm:$0xf0] }
  0x40   :  { %1094 = vmatpush.bf16.msra.mxu1 %v2277_v14  ;;  %v2514_v14 = vld [vmem:[#allocation2 + $0x3d0] sm:$0xf0]  ;;  %v3003_v25 = vld [vmem:[#allocation2 + $0x3a4] sm:$0xf]  ;;  %v2409_v18 = vor.u32 %v2982_v8, %v2408_v6  ;;  %v2328_v6 = vld [vmem:[#allocation2 + $0x248] sm:$0xf] }
  0x41   :  { %1107 = vmatpush.bf16.msra.mxu2 %v2405_v20  ;;  %v2517_v16 = vor.u32 %v3007_v13, %v2514_v14  ;;  %v2891_v20 = vld [vmem:[#allocation2 + $0x24] sm:$0xf]  ;;  %v2306_v24 = vld [vmem:[#allocation2 + $0x230] sm:$0xf0]  ;;  %v2248_v14 = vld [vmem:[#allocation2 + $0x1a8] sm:$0xf] }
  0x42   :  { %1083 = vmatpush.bf16.msrb.mxu0 %v2117_v38  ;;  %v2053_v23 = vor.u32 %v2891_v20, %v2050_v21  ;;  %v2498_v26 = vld [vmem:[#allocation2 + $0x3b0] sm:$0xf0]  ;;  %v2887_v29 = vld [vmem:[#allocation2 + $0x4] sm:$0xf]  ;;  %v2914_v20 = vld [vmem:[#allocation2 + $0xd4] sm:$0xf0] }
  0x43   :  { %1073 = vmatpush.bf16.msra.mxu3 %v2449_v33  ;;  %v2501_v28 = vor.u32 %v3003_v25, %v2498_v26  ;;  %v2034_v30 = vld [vmem:[#allocation2 + $0x10] sm:$0xf0]  ;;  %v2951_v31 = vld [vmem:[#allocation2 + $0x204] sm:$0xf] }
  0x44   :  { %1095 = vmatpush.bf16.msra.mxu1 %v2261_v27  ;;  %v2309_v27 = vor.u32 %v2955_v22, %v2306_v24  ;;  %v2290_v33 = vld [vmem:[#allocation2 + $0x210] sm:$0xf0]  ;;  %v2999_v34 = vld [vmem:[#allocation2 + $0x384] sm:$0xf]  ;;  %v2392_v22 = vld [vmem:[#allocation2 + $0x2c8] sm:$0xf] }
  0x45   :  { %1108 = vmatpush.bf16.msra.mxu2 %v2389_v32  ;;  %v2037_v32 = vor.u32 %v2887_v29, %v2034_v30  ;;  %v2482_v35 = vld [vmem:[#allocation2 + $0x390] sm:$0xf0]  ;;  %v2293_v36 = vor.u32 %v2951_v31, %v2290_v33  ;;  %v2995_v38 = vld [vmem:[#allocation2 + $0x364] sm:$0xf]  ;;  %v2938_v29 = vld [vmem:[#allocation2 + $0x194] sm:$0xf0] }
  0x46   :  { %1084 = vmatpush.bf16.msrb.mxu0 %v2101_v48  ;;  %v2485_v37 = vor.u32 %v2999_v34, %v2482_v35  ;;  %v2991_v41 = vld [vmem:[#allocation2 + $0x344] sm:$0xf]  ;;  %v2450_v42 = vld [vmem:[#allocation2 + $0x350] sm:$0xf0]  ;;  %v2120_v31 = vld [vmem:[#allocation2 + $0xa8] sm:$0xf] }
  0x47   :  { %1074 = vmatpush.bf16.msra.mxu3 %v2433_v45  ;;  %v2453_v43 = vor.u32 %v2991_v41, %v2450_v42  ;;  %v2434_v45 = vld [vmem:[#allocation2 + $0x330] sm:$0xf0]  ;;  %v2983_v48 = vld [vmem:[#allocation2 + $0x304] sm:$0xf]  ;;  %v2376_v33 = vld [vmem:[#allocation2 + $0x2a8] sm:$0xf] }
  0x48   :  { %1096 = vmatpush.bf16.msra.mxu1 %v2245_v39  ;;  %v2466_v39 = vld [vmem:[#allocation2 + $0x370] sm:$0xf0]  ;;  %v2974_v34 = vld [vmem:[#allocation2 + $0x2b4] sm:$0xf0]  ;;  %v2104_v41 = vld [vmem:[#allocation2 + $0x88] sm:$0xf] }
  0x49   :  { %1109 = vmatpush.bf16.msra.mxu2 %v2373_v44  ;;  %v2469_v40 = vor.u32 %v2995_v38, %v2466_v39  ;;  %v2987_v44 = vld [vmem:[#allocation2 + $0x324] sm:$0xf]  ;;  %v2216_v38 = vld [vmem:[#allocation2 + $0x168] sm:$0xf]  ;;  %v2934_v39 = vld [vmem:[#allocation2 + $0x174] sm:$0xf0] }
  0x4a   :  { %1085 = vmatpush.bf16.msrb.mxu0 %v2085_v0  ;;  %v2437_v46 = vor.u32 %v2987_v44, %v2434_v45  ;;  %v2906_v42 = vld [vmem:[#allocation2 + $0x94] sm:$0xf0] }
  0x4b   :  { %1075 = vmatpush.bf16.msra.mxu3 %v2417_v60  ;;  %v2970_v44 = vld [vmem:[#allocation2 + $0x294] sm:$0xf0] }
  0x4c   :  { %1097 = vmatpush.bf16.msra.mxu1 %v2229_v49  ;;  %v2418_v49 = vld [vmem:[#allocation2 + $0x310] sm:$0xf0] }
  0x4d   :  { %1110 = vmatpush.bf16.msra.mxu2 %v2357_v53  ;;  %v2421_v50 = vor.u32 %v2983_v48, %v2418_v49  ;;  %v2105_v49 = vor.u32 %v2906_v42, %v2104_v41  ;;  %v2154_v41 = vld [vmem:[#allocation2 + $0xf8] sm:$0xf0] }
  0x4e   :  { %1086 = vmatpush.bf16.msrb.mxu0 %v2069_v11  ;;  %v2265_v11 = vor.u32 %v2946_v2, %v2264_v1 }
  0x4f   :  { %1120 = vmatpush.bf16.msrb.mxu3 %v2533_v4  ;;  %v2152_v4 = vld [vmem:[#allocation2 + $0xe8] sm:$0xf] }
  0x50   :  { %1098 = vmatpush.bf16.msra.mxu1 %v2213_v54  ;;  %v2153_v13 = vor.u32 %v2918_v5, %v2152_v4  ;;  %v2898_v5 = vld [vmem:[#allocation2 + $0x54] sm:$0xf0] }
  0x51   :  { %1111 = vmatpush.bf16.msra.mxu2 %v2341_v3 }
  0x52   :  { %1087 = vmatpush.bf16.msrb.mxu0 %v2053_v23  ;;  %v2978_v23 = vld [vmem:[#allocation2 + $0x2d4] sm:$0xf0] }
  0x53   :  { %1121 = vmatpush.bf16.msrb.mxu3 %v2517_v16  ;;  %v2393_v30 = vor.u32 %v2978_v23, %v2392_v22  ;;  %v2894_v22 = vld [vmem:[#allocation2 + $0x34] sm:$0xf0]  ;;  %v2312_v23 = vld [vmem:[#allocation2 + $0x228] sm:$0xf] }
  0x54   :  { %1099 = vmatpush.bf16.msra.mxu1 %v2197_v57  ;;  %v2950_v57 = vld [vmem:[#allocation2 + $0x1f4] sm:$0xf0] }
  0x55   :  { %1112 = vmatpush.bf16.msra.mxu2 %v2325_v15  ;;  %v2281_v62 = vor.u32 %v2950_v57, %v2280_v56  ;;  %v2942_v15 = vld [vmem:[#allocation2 + $0x1b4] sm:$0xf0] }
  0x56   :  { %1088 = vmatpush.bf16.msrb.mxu0 %v2037_v32  ;;  %v2249_v25 = vor.u32 %v2942_v15, %v2248_v14  ;;  %v2910_v32 = vld [vmem:[#allocation2 + $0xb4] sm:$0xf0] }
  0x57   :  { %1122 = vmatpush.bf16.msrb.mxu3 %v2501_v28  ;;  %v2232_v28 = vld [vmem:[#allocation2 + $0x188] sm:$0xf]  ;;  %v2966_v57 = vld [vmem:[#allocation2 + $0x274] sm:$0xf0] }
  0x58   :  { %1100 = vmatpush.bf16.msra.mxu1 %v2181_v7  ;;  %v2233_v35 = vor.u32 %v2938_v29, %v2232_v28  ;;  %v2944_v29 = vld [vmem:[#allocation2 + $0x1cc] sm:$0xf] }
  0x59   :  { %1113 = vmatpush.bf16.msra.mxu2 %v2309_v27 }
  0x5b   :  { %1123 = vmatpush.bf16.msrb.mxu3 %v2485_v37  ;;  %v2121_v37 = vor.u32 %v2910_v32, %v2120_v31  ;;  %v2266_v32 = vld [vmem:[#allocation2 + $0x1d8] sm:$0xf0] }
  0x5c   :  { %1101 = vmatpush.bf16.msra.mxu1 %v2165_v19  ;;  %v2136_v19 = vld [vmem:[#allocation2 + $0xc8] sm:$0xf]  ;;  %v2269_v42 = vor.u32 %v2944_v29, %v2266_v32  ;;  %v2964_v32 = vld [vmem:[#allocation2 + $0x26c] sm:$0xf] }
  0x5d   :  { %1114 = vmatpush.bf16.msra.mxu2 %v2293_v36  ;;  %v2137_v26 = vor.u32 %v2914_v20, %v2136_v19  ;;  %v94_v36 = vperm.slane %v3341_v47, 3  ;;  %v2088_v47 = vld [vmem:[#allocation2 + $0x68] sm:$0xf] }
  0x5e   :  { %v2056_v19 = vld [vmem:[#allocation2 + $0x28] sm:$0xf] }
  0x5f   :  { %1124 = vmatpush.bf16.msrb.mxu3 %v2469_v40  ;;  %v2377_v40 = vor.u32 %v2974_v34, %v2376_v33  ;;  %v2040_v33 = vld [vmem:[#allocation2 + $0x8] sm:$0xf]  ;;  %v2890_v34 = vld [vmem:[#allocation2 + $0x14] sm:$0xf0] }
  0x63   :  { %1125 = vmatpush.bf16.msrb.mxu3 %v2453_v43  ;;  %v2360_v43 = vld [vmem:[#allocation2 + $0x288] sm:$0xf] }
  0x67   :  { %1126 = vmatpush.bf16.msrb.mxu3 %v2437_v46  ;;  %v2217_v46 = vor.u32 %v2934_v39, %v2216_v38  ;;  %v2488_v38 = vld [vmem:[#allocation2 + $0x388] sm:$0xf]  ;;  %v3002_v39 = vld [vmem:[#allocation2 + $0x394] sm:$0xf0] }
  0x6b   :  { %1127 = vmatpush.bf16.msrb.mxu3 %v2421_v50  ;;  %v2200_v50 = vld [vmem:[#allocation2 + $0x148] sm:$0xf] }
  0x9c   :  { %v205_v53 = vpop.f32.mrf.mxu1 }
  0x9d   :  { %v206_v54 = vadd.f32 %v205_v53, %v92_v52  ;;  %v2930_v52 = vld [vmem:[#allocation2 + $0x154] sm:$0xf0]  ;;  %v2361_v53 = vor.u32 %v2970_v44, %v2360_v43  ;;  %v2980_v43 = vld [vmem:[#allocation2 + $0x2ec] sm:$0xf]  ;;  %v2410_v44 = vld [vmem:[#allocation2 + $0x2f8] sm:$0xf0] }
  0x9f   :  { %vm236_vm1 = vcmp.gt.f32.partialorder %v206_v54, 0.0  ;;  %v240_v58 = vmul.f32 0.01, %v206_v54 }
  0xa1   :  { %v244_v60 = vsel %vm236_vm1, %v206_v54, %v240_v58  ;;  %v192_v61 = vpop.f32.mrf.mxu3  ;;  %v2902_v54 = vld [vmem:[#allocation2 + $0x74] sm:$0xf0]  ;;  %v2201_v58 = vor.u32 %v2930_v52, %v2200_v50  ;;  %v2489_v50 = vor.u32 %v3002_v39, %v2488_v38  ;;  %v2186_v38 = vld [vmem:[#allocation2 + $0x138] sm:$0xf0] }
  0xa2   :  { %v3346_v63 = vpack.c.bf16 %v244_v60, %v244_v60  ;;  %v193_v0 = vadd.f32 %v192_v61, %v91_v55  ;;  %v2344_v55 = vld [vmem:[#allocation2 + $0x268] sm:$0xf]  ;;  %v3014_v60 = vld [vmem:[#allocation2 + $0x3f4] sm:$0xf0]  ;;  %v2089_v1 = vor.u32 %v2902_v54, %v2088_v47  ;;  %v2413_v47 = vor.u32 %v2980_v43, %v2410_v44  ;;  %v2896_v43 = vld [vmem:[#allocation2 + $0x4c] sm:$0xf] }
  0xa3   :  { %v218_v51 = vpop.f32.mrf.mxu2  ;;  %v2345_v2 = vor.u32 %v2966_v57, %v2344_v55  ;;  %v2998_v54 = vld [vmem:[#allocation2 + $0x374] sm:$0xf0]  ;;  %v2912_v55 = vld [vmem:[#allocation2 + $0xcc] sm:$0xf]  ;;  %v2074_v44 = vld [vmem:[#allocation2 + $0x58] sm:$0xf0] }
  0xa4   :  { %v219_v3 = vadd.f32 %v218_v51, %v93_v59  ;;  %vm235_vm2 = vcmp.gt.f32.partialorder %v193_v0, 0.0  ;;  %v239_v7 = vmul.f32 0.01, %v193_v0  ;;  %1050 = vmatmul.bf16.vlgmr.msrb.gmra.mxu1 %v3346_v63  ;;  %v207_v9 = vpop.f32.mrf.mxu1  ;;  %v2536_v59 = vld [vmem:[#allocation2 + $0x3e8] sm:$0xf] }
  0xa5   :  { %1146 = vmatpush.bf16.msrb.mxu1 %v2281_v62  ;;  %v2184_v62 = vld [vmem:[#allocation2 + $0x128] sm:$0xf]  ;;  %v2537_v4 = vor.u32 %v3014_v60, %v2536_v59  ;;  %v2394_v59 = vld [vmem:[#allocation2 + $0x2d8] sm:$0xf0]  ;;  %v2936_v60 = vld [vmem:[#allocation2 + $0x18c] sm:$0xf] }
  0xa6   :  { %vm237_vm3 = vcmp.gt.f32.partialorder %v219_v3, 0.0  ;;  %v241_v10 = vmul.f32 0.01, %v219_v3  ;;  %v243_v12 = vsel %vm235_vm2, %v193_v0, %v239_v7  ;;  %v2926_v0 = vld [vmem:[#allocation2 + $0x134] sm:$0xf0] }
  0xa7   :  { %v3349_v16 = vpack.c.bf16 %v243_v12, %v243_v12  ;;  %v2962_v7 = vld [vmem:[#allocation2 + $0x254] sm:$0xf0]  ;;  %v2185_v9 = vor.u32 %v2926_v0, %v2184_v62  ;;  %v2168_v12 = vld [vmem:[#allocation2 + $0x108] sm:$0xf] }
  0xa8   :  { %v245_v17 = vsel %vm237_vm3, %v219_v3, %v241_v10  ;;  %v2072_v3 = vld [vmem:[#allocation2 + $0x48] sm:$0xf]  ;;  %v2329_v15 = vor.u32 %v2962_v7, %v2328_v6  ;;  %v2972_v7 = vld [vmem:[#allocation2 + $0x2ac] sm:$0xf] }
  0xa9   :  { %v3351_v21 = vpack.c.bf16 %v245_v17, %v245_v17  ;;  %1147 = vmatpush.bf16.msrb.mxu1 %v2265_v11  ;;  %v194_v24 = vpop.f32.mrf.mxu3  ;;  %1037 = vmatmul.bf16.vlgmr.msra.gmra.mxu0 %v3349_v16  ;;  %v2520_v10 = vld [vmem:[#allocation2 + $0x3c8] sm:$0xf]  ;;  %v3010_v11 = vld [vmem:[#allocation2 + $0x3d4] sm:$0xf0]  ;;  %v2073_v14 = vor.u32 %v2898_v5, %v2072_v3  ;;  %v2948_v17 = vld [vmem:[#allocation2 + $0x1ec] sm:$0xf] }
  0xaa   :  { %1133 = vmatpush.bf16.msra.mxu0 %v2153_v13  ;;  %v2922_v13 = vld [vmem:[#allocation2 + $0x114] sm:$0xf0]  ;;  %v2521_v20 = vor.u32 %v3010_v11, %v2520_v10  ;;  %v2122_v5 = vld [vmem:[#allocation2 + $0xb8] sm:$0xf0] }
  0xab   :  { %1063 = vmatmul.bf16.vlgmr.msrb.gmra.mxu2 %v3351_v21  ;;  %v220_v27 = vpop.f32.mrf.mxu2  ;;  %v2958_v24 = vld [vmem:[#allocation2 + $0x234] sm:$0xf0]  ;;  %v2218_v10 = vld [vmem:[#allocation2 + $0x178] sm:$0xf0] }
  0xac   :  { %1159 = vmatpush.bf16.msrb.mxu2 %v2409_v18  ;;  %v2282_v18 = vld [vmem:[#allocation2 + $0x1f8] sm:$0xf0]  ;;  %v3006_v27 = vld [vmem:[#allocation2 + $0x3b4] sm:$0xf0]  ;;  %v2313_v31 = vor.u32 %v2958_v24, %v2312_v23  ;;  %v2928_v23 = vld [vmem:[#allocation2 + $0x14c] sm:$0xf] }
  0xad   :  { %1148 = vmatpush.bf16.msrb.mxu1 %v2249_v25  ;;  %v2169_v25 = vor.u32 %v2922_v13, %v2168_v12  ;;  %v2285_v28 = vor.u32 %v2948_v17, %v2282_v18  ;;  %v2994_v3 = vld [vmem:[#allocation2 + $0x354] sm:$0xf0]  ;;  %v2440_v13 = vld [vmem:[#allocation2 + $0x328] sm:$0xf]  ;;  %v2904_v17 = vld [vmem:[#allocation2 + $0x8c] sm:$0xf] }
  0xae   :  { %1134 = vmatpush.bf16.msra.mxu0 %v2137_v26  ;;  %v2504_v26 = vld [vmem:[#allocation2 + $0x3a8] sm:$0xf]  ;;  %v2106_v18 = vld [vmem:[#allocation2 + $0x98] sm:$0xf0] }
  0xaf   :  { %v2202_v24 = vld [vmem:[#allocation2 + $0x158] sm:$0xf0] }
  0xb0   :  { %1160 = vmatpush.bf16.msrb.mxu2 %v2393_v30  ;;  %v2057_v30 = vor.u32 %v2894_v22, %v2056_v19  ;;  %v2362_v22 = vld [vmem:[#allocation2 + $0x298] sm:$0xf0] }
  0xb1   :  { %1149 = vmatpush.bf16.msrb.mxu1 %v2233_v35  ;;  %v231_v45 = vpop.f32.mrf.mxu3  ;;  %v2505_v35 = vor.u32 %v3006_v27, %v2504_v26  ;;  %v2109_v26 = vor.u32 %v2904_v17, %v2106_v18  ;;  %v2424_v27 = vld [vmem:[#allocation2 + $0x308] sm:$0xf]  ;;  %v2592_v18 = vld [vmem:[#allocation4 + $0x60] sm:$0xf] }
  0xb2   :  { %v232_v48 = vadd.f32 %v231_v45, %v94_v36  ;;  %1135 = vmatpush.bf16.msra.mxu0 %v2121_v37  ;;  %v2296_v36 = vld [vmem:[#allocation2 + $0x208] sm:$0xf]  ;;  %v2954_v37 = vld [vmem:[#allocation2 + $0x214] sm:$0xf0]  ;;  %v2041_v45 = vor.u32 %v2890_v34, %v2040_v33  ;;  %v2205_v33 = vor.u32 %v2928_v23, %v2202_v24  ;;  %v2346_v34 = vld [vmem:[#allocation2 + $0x278] sm:$0xf0] }
  0xb3   :  { %v2458_v23 = vld [vmem:[#allocation2 + $0x358] sm:$0xf0] }
  0xb4   :  { %1161 = vmatpush.bf16.msrb.mxu2 %v2377_v40  ;;  %vm238_vm4 = vcmp.gt.f32.partialorder %v232_v48, 0.0  ;;  %v242_v56 = vmul.f32 0.01, %v232_v48  ;;  %1102 = vmatmul.bf16.vlgmr.msra.gmra.mxu1 %v3346_v63  ;;  %v2916_v40 = vld [vmem:[#allocation2 + $0xec] sm:$0xf] }
  0xb5   :  { %1150 = vmatpush.bf16.msrb.mxu1 %v2217_v46  ;;  %v2297_v46 = vor.u32 %v2954_v37, %v2296_v36  ;;  %v2157_v52 = vor.u32 %v2916_v40, %v2154_v41  ;;  %v2538_v36 = vld [vmem:[#allocation2 + $0x3f8] sm:$0xf0]  ;;  %v2924_v37 = vld [vmem:[#allocation2 + $0x12c] sm:$0xf]  ;;  %v2349_v41 = vor.u32 %v2964_v32, %v2346_v34  ;;  %v3026_v32 = vld [vmem:[#allocation4 + $0x54] sm:$0xf0] }
  0xb6   :  { %v246_v61 = vsel %vm238_vm4, %v232_v48, %v242_v56  ;;  %1136 = vmatpush.bf16.msra.mxu0 %v2105_v49  ;;  %v2940_v48 = vld [vmem:[#allocation2 + $0x1ac] sm:$0xf]  ;;  %v2250_v49 = vld [vmem:[#allocation2 + $0x1b8] sm:$0xf0]  ;;  %v3024_v34 = vld [vmem:[#allocation4 + $0x44] sm:$0xf0] }
  0xb7   :  { %v3357_v51 = vpack.c.bf16 %v246_v61, %v246_v61  ;;  %v2138_v56 = vld [vmem:[#allocation2 + $0xd8] sm:$0xf0]  ;;  %v2253_v57 = vor.u32 %v2940_v48, %v2250_v49  ;;  %v3008_v49 = vld [vmem:[#allocation2 + $0x3cc] sm:$0xf] }
  0xb8   :  { %1162 = vmatpush.bf16.msrb.mxu2 %v2361_v53  ;;  %v2472_v53 = vld [vmem:[#allocation2 + $0x368] sm:$0xf]  ;;  %v2234_v61 = vld [vmem:[#allocation2 + $0x198] sm:$0xf0]  ;;  %v2141_v0 = vor.u32 %v2912_v55, %v2138_v56  ;;  %v2892_v56 = vld [vmem:[#allocation2 + $0x2c] sm:$0xf] }
  0xb9   :  { %1151 = vmatpush.bf16.msrb.mxu1 %v2201_v58  ;;  %v233_v8 = vpop.f32.mrf.mxu3  ;;  %1076 = vmatmul.bf16.vlgmr.msra.gmra.mxu3 %v3357_v51  ;;  %v2976_v58 = vld [vmem:[#allocation2 + $0x2cc] sm:$0xf]  ;;  %v2473_v62 = vor.u32 %v2998_v54, %v2472_v53  ;;  %v2237_v6 = vor.u32 %v2936_v60, %v2234_v61  ;;  %v2330_v48 = vld [vmem:[#allocation2 + $0x258] sm:$0xf0] }
  0xba   :  { %1089 = vmatmul.bf16.vlgmr.msrb.gmra.mxu0 %v3349_v16  ;;  %1172 = vmatpush.bf16.msra.mxu3 %v2537_v4  ;;  %v2908_v4 = vld [vmem:[#allocation2 + $0xac] sm:$0xf]  ;;  %v2378_v8 = vld [vmem:[#allocation2 + $0x2b8] sm:$0xf0] }
  0xbb   :  { %1115 = vmatmul.bf16.vlgmr.msra.gmra.mxu2 %v3351_v21  ;;  %1137 = vmatpush.bf16.msra.mxu0 %v2089_v1  ;;  %v2456_v1 = vld [vmem:[#allocation2 + $0x348] sm:$0xf]  ;;  %v2125_v12 = vor.u32 %v2908_v4, %v2122_v5  ;;  %v2170_v53 = vld [vmem:[#allocation2 + $0x118] sm:$0xf0]  ;;  %v3004_v61 = vld [vmem:[#allocation2 + $0x3ac] sm:$0xf] }
  0xbc   :  { %1163 = vmatpush.bf16.msrb.mxu2 %v2345_v2  ;;  %v2397_v2 = vor.u32 %v2976_v58, %v2394_v59  ;;  %v2457_v11 = vor.u32 %v2994_v3, %v2456_v1  ;;  %v2956_v58 = vld [vmem:[#allocation2 + $0x22c] sm:$0xf]  ;;  %v2314_v60 = vld [vmem:[#allocation2 + $0x238] sm:$0xf0] }
  0xbd   :  { %1152 = vmatpush.bf16.msrb.mxu1 %v2185_v9  ;;  %v2932_v9 = vld [vmem:[#allocation2 + $0x16c] sm:$0xf]  ;;  %v2317_v1 = vor.u32 %v2956_v58, %v2314_v60  ;;  %v2042_v4 = vld [vmem:[#allocation2 + $0x18] sm:$0xf0]  ;;  %v3029_v58 = vld [vmem:[#allocation4 + $0x74] sm:$0xf] }
  0xbe   :  { %1173 = vmatpush.bf16.msra.mxu3 %v2521_v20  ;;  %v2221_v19 = vor.u32 %v2932_v9, %v2218_v10  ;;  %v2968_v20 = vld [vmem:[#allocation2 + $0x28c] sm:$0xf]  ;;  %v2600_v9 = vld [vmem:[#allocation4 + $0x70] sm:$0xf]  ;;  %v3030_v10 = vld [vmem:[#allocation4 + $0x74] sm:$0xf0] }
  0xbf   :  { %1138 = vmatpush.bf16.msra.mxu0 %v2073_v14  ;;  %v2381_v14 = vor.u32 %v2972_v7, %v2378_v8  ;;  %v2365_v29 = vor.u32 %v2968_v20, %v2362_v22  ;;  %v2888_v3 = vld [vmem:[#allocation2 + $0xc] sm:$0xf]  ;;  %v2490_v8 = vld [vmem:[#allocation2 + $0x398] sm:$0xf0]  ;;  %v2601_v17 = vor.u32 %v3030_v10, %v2600_v9  ;;  %v3036_v9 = vld [vmem:[#allocation4 + $0xa4] sm:$0xf0] }
  0xc0   :  { %1164 = vmatpush.bf16.msrb.mxu2 %v2329_v15  ;;  %v2990_v15 = vld [vmem:[#allocation2 + $0x334] sm:$0xf0]  ;;  %v2952_v5 = vld [vmem:[#allocation2 + $0x20c] sm:$0xf]  ;;  %v2720_v10 = vld [vmem:[#allocation4 + $0x160] sm:$0xf] }
  0xc1   :  { %1153 = vmatpush.bf16.msrb.mxu1 %v2169_v25  ;;  %v2441_v25 = vor.u32 %v2990_v15, %v2440_v13  ;;  %v3000_v7 = vld [vmem:[#allocation2 + $0x38c] sm:$0xf]  ;;  %v2474_v15 = vld [vmem:[#allocation2 + $0x378] sm:$0xf0] }
  0xc2   :  { %1174 = vmatpush.bf16.msra.mxu3 %v2505_v35  ;;  %v3012_v35 = vld [vmem:[#allocation2 + $0x3ec] sm:$0xf]  ;;  %v2493_v13 = vor.u32 %v3000_v7, %v2490_v8  ;;  %v2624_v8 = vld [vmem:[#allocation4 + $0xa0] sm:$0xf] }
  0xc3   :  { %1139 = vmatpush.bf16.msra.mxu0 %v2057_v30  ;;  %v2900_v30 = vld [vmem:[#allocation2 + $0x6c] sm:$0xf] }
  0xc4   :  { %1165 = vmatpush.bf16.msrb.mxu2 %v2313_v31  ;;  %1154 = vmatmul.bf16.vlgmr.msrb.gmra.mxu1 %v3346_v63  ;;  %v2090_v31 = vld [vmem:[#allocation2 + $0x78] sm:$0xf0]  ;;  %v2992_v22 = vld [vmem:[#allocation2 + $0x34c] sm:$0xf] }
  0xc5   :  { %1198 = vmatpush.bf16.msra.mxu1 %v2285_v28  ;;  %v2986_v28 = vld [vmem:[#allocation2 + $0x314] sm:$0xf0]  ;;  %v2093_v40 = vor.u32 %v2900_v30, %v2090_v31  ;;  %v2584_v31 = vld [vmem:[#allocation4 + $0x50] sm:$0xf] }
  0xc6   :  { %1175 = vmatpush.bf16.msra.mxu3 %v2489_v50  ;;  %v2425_v39 = vor.u32 %v2986_v28, %v2424_v27  ;;  %v2522_v50 = vld [vmem:[#allocation2 + $0x3d8] sm:$0xf0]  ;;  %v2984_v28 = vld [vmem:[#allocation2 + $0x30c] sm:$0xf] }
  0xc7   :  { %1140 = vmatpush.bf16.msra.mxu0 %v2041_v45  ;;  %v2960_v45 = vld [vmem:[#allocation2 + $0x24c] sm:$0xf]  ;;  %v2525_v55 = vor.u32 %v3008_v49, %v2522_v50  ;;  %v2648_v49 = vld [vmem:[#allocation4 + $0xd0] sm:$0xf] }
  0xc8   :  { %1166 = vmatpush.bf16.msrb.mxu2 %v2297_v46  ;;  %v2189_v46 = vor.u32 %v2924_v37, %v2186_v38  ;;  %v2333_v54 = vor.u32 %v2960_v45, %v2330_v48  ;;  %v2664_v37 = vld [vmem:[#allocation4 + $0xf0] sm:$0xf]  ;;  %v3018_v48 = vld [vmem:[#allocation4 + $0x14] sm:$0xf0] }
  0xc9   :  { %1199 = vmatpush.bf16.msra.mxu1 %v2269_v42  ;;  %1128 = vmatmul.bf16.vlgmr.msrb.gmra.mxu3 %v3357_v51  ;;  %v2541_v42 = vor.u32 %v3012_v35, %v2538_v36  ;;  %v2568_v35 = vld [vmem:[#allocation4 + $0x30] sm:$0xf]  ;;  %v3022_v36 = vld [vmem:[#allocation4 + $0x34] sm:$0xf0] }
  0xca   :  { %1141 = vmatmul.bf16.vlgmr.msra.gmra.mxu0 %v3349_v16  ;;  %1176 = vmatpush.bf16.msra.mxu3 %v2473_v62  ;;  %v2506_v62 = vld [vmem:[#allocation2 + $0x3b8] sm:$0xf0]  ;;  %v2569_v38 = vor.u32 %v3022_v36, %v2568_v35  ;;  %v3045_v36 = vld [vmem:[#allocation4 + $0xf4] sm:$0xf] }
  0xcb   :  { %1185 = vmatpush.bf16.msrb.mxu0 %v2157_v52  ;;  %1167 = vmatmul.bf16.vlgmr.msrb.gmra.mxu2 %v3351_v21  ;;  %v2920_v52 = vld [vmem:[#allocation2 + $0x10c] sm:$0xf] }
  0xcc   :  { %1211 = vmatpush.bf16.msra.mxu2 %v2413_v47  ;;  %v2077_v47 = vor.u32 %v2896_v43, %v2074_v44  ;;  %v2173_v59 = vor.u32 %v2920_v52, %v2170_v53  ;;  %v2656_v43 = vld [vmem:[#allocation4 + $0xe0] sm:$0xf]  ;;  %v3044_v44 = vld [vmem:[#allocation4 + $0xe4] sm:$0xf0]  ;;  %v3042_v52 = vld [vmem:[#allocation4 + $0xd4] sm:$0xf0] }
  0xcd   :  { %1200 = vmatpush.bf16.msra.mxu1 %v2253_v57  ;;  %v2058_v57 = vld [vmem:[#allocation2 + $0x38] sm:$0xf0]  ;;  %v2657_v45 = vor.u32 %v3044_v44, %v2656_v43  ;;  %v2649_v53 = vor.u32 %v3042_v52, %v2648_v49  ;;  %v3019_v43 = vld [vmem:[#allocation4 + $0x24] sm:$0xf]  ;;  %v3376_v49 = vld [vmem:[%s3459_s4] sm:$0xf] }
  0xce   :  { %1177 = vmatpush.bf16.msra.mxu3 %v2457_v11  ;;  %v2045_v11 = vor.u32 %v2888_v3, %v2042_v4  ;;  %v3062_v3 = vld [vmem:[#allocation4 + $0x174] sm:$0xf0]  ;;  %v3027_v4 = vld [vmem:[#allocation4 + $0x64] sm:$0xf]  ;;  %v3052_v52 = vld [vmem:[#allocation4 + $0x124] sm:$0xf0] }
  0xcf   :  { %1186 = vmatpush.bf16.msrb.mxu0 %v2141_v0  ;;  %v2061_v0 = vor.u32 %v2892_v56, %v2058_v57  ;;  %v3040_v57 = vld [vmem:[#allocation4 + $0xc4] sm:$0xf0]  ;;  %v3043_v44 = vld [vmem:[#allocation4 + $0xe4] sm:$0xf] }
  0xd0   :  { %1212 = vmatpush.bf16.msra.mxu2 %v2397_v2  ;;  %v2509_v2 = vor.u32 %v3004_v61, %v2506_v62  ;;  %v2632_v62 = vld [vmem:[#allocation4 + $0xb0] sm:$0xf] }
  0xd1   :  { %1201 = vmatpush.bf16.msra.mxu1 %v2237_v6  ;;  %v2298_v6 = vld [vmem:[#allocation2 + $0x218] sm:$0xf0] }
  0xd2   :  { %1178 = vmatpush.bf16.msra.mxu3 %v2441_v25  ;;  %v2461_v25 = vor.u32 %v2992_v22, %v2458_v23 }
  0xd3   :  { %1187 = vmatpush.bf16.msrb.mxu0 %v2125_v12  ;;  %v2301_v12 = vor.u32 %v2952_v5, %v2298_v6  ;;  %v2594_v5 = vld [vmem:[#allocation4 + $0x68] sm:$0xf0] }
  0xd4   :  { %1213 = vmatpush.bf16.msra.mxu2 %v2381_v14  ;;  %v2996_v14 = vld [vmem:[#allocation2 + $0x36c] sm:$0xf]  ;;  %v2597_v7 = vor.u32 %v3027_v4, %v2594_v5  ;;  %v3039_v5 = vld [vmem:[#allocation4 + $0xc4] sm:$0xf] }
  0xd5   :  { %1202 = vmatpush.bf16.msra.mxu1 %v2221_v19  ;;  %v3028_v19 = vld [vmem:[#allocation4 + $0x64] sm:$0xf0]  ;;  %v2477_v20 = vor.u32 %v2996_v14, %v2474_v15  ;;  %v2586_v14 = vld [vmem:[#allocation4 + $0x58] sm:$0xf0]  ;;  %v2546_v4 = vld [vmem:[#allocation4 + $0x8] sm:$0xf0] }
  0xd6   :  { %1179 = vmatpush.bf16.msra.mxu3 %v2425_v39  ;;  %v2593_v24 = vor.u32 %v3028_v19, %v2592_v18  ;;  %v3046_v39 = vld [vmem:[#allocation4 + $0xf4] sm:$0xf0]  ;;  %v2616_v18 = vld [vmem:[#allocation4 + $0x90] sm:$0xf] }
  0xd7   :  { %1188 = vmatpush.bf16.msrb.mxu0 %v2109_v26  ;;  %v2442_v26 = vld [vmem:[#allocation2 + $0x338] sm:$0xf0]  ;;  %v3034_v19 = vld [vmem:[#allocation4 + $0x94] sm:$0xf0] }
  0xd8   :  { %1214 = vmatpush.bf16.msra.mxu2 %v2365_v29  ;;  %v2426_v29 = vld [vmem:[#allocation2 + $0x318] sm:$0xf0]  ;;  %v2617_v23 = vor.u32 %v3034_v19, %v2616_v18 }
  0xd9   :  { %1203 = vmatpush.bf16.msra.mxu1 %v2205_v33  ;;  %1180 = vmatmul.bf16.vlgmr.msra.gmra.mxu3 %v3357_v51  ;;  %v2429_v30 = vor.u32 %v2984_v28, %v2426_v29  ;;  %v2585_v33 = vor.u32 %v3026_v32, %v2584_v31  ;;  %v2608_v28 = vld [vmem:[#allocation4 + $0x80] sm:$0xf]  ;;  %v3032_v29 = vld [vmem:[#allocation4 + $0x84] sm:$0xf0]  ;;  %v2634_v18 = vld [vmem:[#allocation4 + $0xb8] sm:$0xf0] }
  0xda   :  { %1224 = vmatpush.bf16.msrb.mxu3 %v2541_v42  ;;  %v3020_v42 = vld [vmem:[#allocation4 + $0x24] sm:$0xf0]  ;;  %v2609_v31 = vor.u32 %v3032_v29, %v2608_v28  ;;  %v3035_v28 = vld [vmem:[#allocation4 + $0xa4] sm:$0xf]  ;;  %v2626_v29 = vld [vmem:[#allocation4 + $0xa8] sm:$0xf0] }
  0xdb   :  { %1189 = vmatpush.bf16.msrb.mxu0 %v2093_v40  ;;  %v2665_v40 = vor.u32 %v3046_v39, %v2664_v37  ;;  %v3056_v32 = vld [vmem:[#allocation4 + $0x144] sm:$0xf0]  ;;  %v2666_v37 = vld [vmem:[#allocation4 + $0xf8] sm:$0xf0]  ;;  %v2696_v39 = vld [vmem:[#allocation4 + $0x130] sm:$0xf] }
  0xdc   :  { %1215 = vmatpush.bf16.msra.mxu2 %v2349_v41  ;;  %v2560_v41 = vld [vmem:[#allocation4 + $0x20] sm:$0xf] }
  0xdd   :  { %1204 = vmatpush.bf16.msra.mxu1 %v2189_v46  ;;  %v2552_v46 = vld [vmem:[#allocation4 + $0x10] sm:$0xf] }
  0xde   :  { %1225 = vmatpush.bf16.msrb.mxu3 %v2525_v55  ;;  %v2553_v50 = vor.u32 %v3018_v48, %v2552_v46  ;;  %v2640_v55 = vld [vmem:[#allocation4 + $0xc0] sm:$0xf]  ;;  %v2658_v46 = vld [vmem:[#allocation4 + $0xe8] sm:$0xf0] }
  0xdf   :  { %1190 = vmatpush.bf16.msrb.mxu0 %v2077_v47  ;;  %v2544_v47 = vld [vmem:[#allocation4] sm:$0xf]  ;;  %v2641_v60 = vor.u32 %v3040_v57, %v2640_v55  ;;  %v2661_v48 = vor.u32 %v3043_v44, %v2658_v46  ;;  %v2554_v55 = vld [vmem:[#allocation4 + $0x18] sm:$0xf0] }
  0xe0   :  { %1216 = vmatpush.bf16.msra.mxu2 %v2333_v54  ;;  %v3016_v54 = vld [vmem:[#allocation4 + $0x4] sm:$0xf0] }
  0xe1   :  { %1205 = vmatpush.bf16.msra.mxu1 %v2173_v59  ;;  %v2545_v56 = vor.u32 %v3016_v54, %v2544_v47  ;;  %v2602_v59 = vld [vmem:[#allocation4 + $0x78] sm:$0xf0]  ;;  %v3017_v54 = vld [vmem:[#allocation4 + $0x14] sm:$0xf] }
  0xe2   :  { %1226 = vmatpush.bf16.msrb.mxu3 %v2509_v2  ;;  %v2605_v61 = vor.u32 %v3029_v58, %v2602_v59  ;;  %v2557_v58 = vor.u32 %v3017_v54, %v2554_v55  ;;  %v2650_v59 = vld [vmem:[#allocation4 + $0xd8] sm:$0xf0] }
  0xe3   :  { %1191 = vmatpush.bf16.msrb.mxu0 %v2061_v0  ;;  %v3038_v0 = vld [vmem:[#allocation4 + $0xb4] sm:$0xf0] }
  0xe4   :  { %1217 = vmatpush.bf16.msra.mxu2 %v2317_v1  ;;  %1206 = vmatmul.bf16.vlgmr.msra.gmra.mxu1 %v3346_v63  ;;  %v2988_v63 = vld [vmem:[#allocation2 + $0x32c] sm:$0xf]  ;;  %v2728_v1 = vld [vmem:[#allocation4 + $0x170] sm:$0xf]  ;;  %v2633_v2 = vor.u32 %v3038_v0, %v2632_v62  ;;  %v3050_v0 = vld [vmem:[#allocation4 + $0x114] sm:$0xf0] }
  0xe5   :  { %v2445_v27 = vor.u32 %v2988_v63, %v2442_v26  ;;  %1656 = vmatpush.bf16.msrb.mxu1 %v2665_v40  ;;  %v2729_v6 = vor.u32 %v3062_v3, %v2728_v1  ;;  %v2578_v63 = vld [vmem:[#allocation4 + $0x48] sm:$0xf0]  ;;  %v3054_v40 = vld [vmem:[#allocation4 + $0x134] sm:$0xf0]  ;;  %v2680_v62 = vld [vmem:[#allocation4 + $0x110] sm:$0xf] }
  0xe6   :  { %1227 = vmatpush.bf16.msrb.mxu3 %v2493_v13  ;;  %v3025_v13 = vld [vmem:[#allocation4 + $0x54] sm:$0xf]  ;;  %v3015_v3 = vld [vmem:[#allocation4 + $0x4] sm:$0xf] }
  0xe7   :  { %1192 = vmatpush.bf16.msrb.mxu0 %v2045_v11  ;;  %v2625_v11 = vor.u32 %v3036_v9, %v2624_v8  ;;  %v2672_v9 = vld [vmem:[#allocation4 + $0x100] sm:$0xf] }
  0xe8   :  { %1218 = vmatpush.bf16.msra.mxu2 %v2301_v12  ;;  %v3060_v12 = vld [vmem:[#allocation4 + $0x164] sm:$0xf0] }
  0xe9   :  { %1657 = vmatpush.bf16.msrb.mxu1 %v2657_v45  ;;  %v2721_v15 = vor.u32 %v3060_v12, %v2720_v10  ;;  %v3048_v10 = vld [vmem:[#allocation4 + $0x104] sm:$0xf0] }
  0xea   :  { %1193 = vmatmul.bf16.vlgmr.msrb.gmra.mxu0 %v3349_v16  ;;  %1228 = vmatpush.bf16.msrb.mxu3 %v2477_v20  ;;  %v2576_v16 = vld [vmem:[#allocation4 + $0x40] sm:$0xf]  ;;  %v2712_v20 = vld [vmem:[#allocation4 + $0x150] sm:$0xf] }
  0xeb   :  { %1643 = vmatpush.bf16.msra.mxu0 %v2601_v17  ;;  %1219 = vmatmul.bf16.vlgmr.msra.gmra.mxu2 %v3351_v21  ;;  %v2577_v21 = vor.u32 %v3024_v34, %v2576_v16  ;;  %v2589_v17 = vor.u32 %v3025_v13, %v2586_v14  ;;  %v2570_v16 = vld [vmem:[#allocation4 + $0x38] sm:$0xf0]  ;;  %v2673_v14 = vor.u32 %v3048_v10, %v2672_v9 }
  0xec   :  { %1669 = vmatpush.bf16.msrb.mxu2 %v2729_v6  ;;  %v2549_v6 = vor.u32 %v3015_v3, %v2546_v4  ;;  %v3070_v3 = vld [vmem:[#allocation4 + $0x1b4] sm:$0xf0] }
  0xed   :  { %1658 = vmatpush.bf16.msrb.mxu1 %v2649_v53 }
  0xee   :  { %1229 = vmatpush.bf16.msrb.mxu3 %v2461_v25  ;;  %v3023_v25 = vld [vmem:[#allocation4 + $0x44] sm:$0xf] }
  0xef   :  { %1644 = vmatpush.bf16.msra.mxu0 %v2593_v24  ;;  %v3058_v24 = vld [vmem:[#allocation4 + $0x154] sm:$0xf0] }
  0xf0   :  { %1670 = vmatpush.bf16.msrb.mxu2 %v2721_v15  ;;  %v2713_v26 = vor.u32 %v3058_v24, %v2712_v20  ;;  %v3078_v15 = vld [vmem:[#allocation4 + $0x1f4] sm:$0xf0]  ;;  %v2730_v24 = vld [vmem:[#allocation4 + $0x178] sm:$0xf0] }
  0xf1   :  { %1659 = vmatpush.bf16.msrb.mxu1 %v2641_v60 }
  0xf2   :  { %1230 = vmatpush.bf16.msrb.mxu3 %v2445_v27  ;;  %v2581_v27 = vor.u32 %v3023_v25, %v2578_v63  ;;  %v2784_v25 = vld [vmem:[#allocation4 + $0x1e0] sm:$0xf] }
  0xf3   :  { %1645 = vmatpush.bf16.msra.mxu0 %v2585_v33  ;;  %v3021_v33 = vld [vmem:[#allocation4 + $0x34] sm:$0xf] }
  0xf4   :  { %1671 = vmatpush.bf16.msrb.mxu2 %v2713_v26  ;;  %v2573_v35 = vor.u32 %v3021_v33, %v2570_v16 }
  0xf5   :  { %1660 = vmatpush.bf16.msrb.mxu1 %v2633_v2  ;;  %v2681_v2 = vor.u32 %v3050_v0, %v2680_v62 }
  0xf6   :  { %1231 = vmatpush.bf16.msrb.mxu3 %v2429_v30  ;;  %v2704_v30 = vld [vmem:[#allocation4 + $0x140] sm:$0xf] }
  0xf7   :  { %1646 = vmatpush.bf16.msra.mxu0 %v2577_v21  ;;  %v2705_v21 = vor.u32 %v3056_v32, %v2704_v30  ;;  %v2722_v32 = vld [vmem:[#allocation4 + $0x168] sm:$0xf0] }
  0xf9   :  { %1232 = vmatmul.bf16.vlgmr.msrb.gmra.mxu3 %v3357_v51  ;;  %v2561_v51 = vor.u32 %v3020_v42, %v2560_v41  ;;  %1661 = vmatpush.bf16.msrb.mxu1 %v2625_v11  ;;  %v2697_v42 = vor.u32 %v3054_v40, %v2696_v39  ;;  %v2792_v11 = vld [vmem:[#allocation4 + $0x1f0] sm:$0xf] }
  0xfa   :  { %1672 = vmatpush.bf16.msrb.mxu2 %v2705_v21  ;;  %v2793_v19 = vor.u32 %v3078_v15, %v2792_v11  ;;  %v2752_v11 = vld [vmem:[#allocation4 + $0x1a0] sm:$0xf] }
  0xfb   :  { %1647 = vmatpush.bf16.msra.mxu0 %v2569_v38  ;;  %v2669_v38 = vor.u32 %v3045_v36, %v2666_v37  ;;  %v2776_v37 = vld [vmem:[#allocation4 + $0x1d0] sm:$0xf] }
  0xfc   :  { %1682 = vmatpush.bf16.msra.mxu3 %v2793_v19 }
  0xfd   :  { %1662 = vmatpush.bf16.msrb.mxu1 %v2617_v23  ;;  %v3061_v23 = vld [vmem:[#allocation4 + $0x174] sm:$0xf] }
  0xfe   :  { %1673 = vmatpush.bf16.msrb.mxu2 %v2697_v42  ;;  %v2733_v26 = vor.u32 %v3061_v23, %v2730_v24  ;;  %v3033_v42 = vld [vmem:[#allocation4 + $0x94] sm:$0xf]  ;;  %v2744_v24 = vld [vmem:[#allocation4 + $0x190] sm:$0xf] }
  0xff   :  { %1648 = vmatpush.bf16.msra.mxu0 %v2561_v51  ;;  %v2562_v51 = vld [vmem:[#allocation4 + $0x28] sm:$0xf0] }
 0x100   :  { %v2565_v45 = vor.u32 %v3019_v43, %v2562_v51  ;;  %v2618_v43 = vld [vmem:[#allocation4 + $0x98] sm:$0xf0]  ;;  %v3057_v51 = vld [vmem:[#allocation4 + $0x154] sm:$0xf] }
 0x101   :  { %1663 = vmatpush.bf16.msrb.mxu1 %v2609_v31  ;;  %v3059_v31 = vld [vmem:[#allocation4 + $0x164] sm:$0xf]  ;;  %v2621_v44 = vor.u32 %v3033_v42, %v2618_v43 }
 0x102   :  { %v2725_v21 = vor.u32 %v3059_v31, %v2722_v32  ;;  %v2736_v32 = vld [vmem:[#allocation4 + $0x180] sm:$0xf]  ;;  %v3075_v43 = vld [vmem:[#allocation4 + $0x1e4] sm:$0xf] }
 0x103   :  { %1649 = vmatpush.bf16.msra.mxu0 %v2553_v50  ;;  %v2688_v50 = vld [vmem:[#allocation4 + $0x120] sm:$0xf] }
 0x104   :  { %v2689_v47 = vor.u32 %v3052_v52, %v2688_v50  ;;  %v382_v50 = vperm.slane %v3376_v49, 1  ;;  %v2768_v52 = vld [vmem:[#allocation4 + $0x1c0] sm:$0xf] }
 0x105   :  { %1708 = vmatpush.bf16.msra.mxu1 %v2669_v38  ;;  %v3074_v38 = vld [vmem:[#allocation4 + $0x1d4] sm:$0xf0] }
 0x106   :  { %1674 = vmatpush.bf16.msrb.mxu2 %v2689_v47 }
 0x107   :  { %1650 = vmatpush.bf16.msra.mxu0 %v2545_v56  ;;  %v3041_v56 = vld [vmem:[#allocation4 + $0xd4] sm:$0xf] }
 0x108   :  { %v2653_v60 = vor.u32 %v3041_v56, %v2650_v59  ;;  %v3031_v56 = vld [vmem:[#allocation4 + $0x84] sm:$0xf] }
 0x109   :  { %1709 = vmatpush.bf16.msra.mxu1 %v2661_v48 }
 0x10a   :  { %1675 = vmatpush.bf16.msrb.mxu2 %v2681_v2  ;;  %v2760_v2 = vld [vmem:[#allocation4 + $0x1b0] sm:$0xf] }
 0x10b   :  { %1695 = vmatpush.bf16.msrb.mxu0 %v2605_v61  ;;  %v381_v61 = vperm.slane %v3376_v49, 0 }
 0x10d   :  { %1710 = vmatpush.bf16.msra.mxu1 %v2653_v60 }
 0x10e   :  { %1676 = vmatpush.bf16.msrb.mxu2 %v2673_v14 }
 0x10f   :  { %1696 = vmatpush.bf16.msrb.mxu0 %v2597_v7  ;;  %v2642_v7 = vld [vmem:[#allocation4 + $0xc8] sm:$0xf0] }
 0x110   :  { %v2645_v8 = vor.u32 %v3039_v5, %v2642_v7  ;;  %v3053_v7 = vld [vmem:[#allocation4 + $0x134] sm:$0xf] }
 0x112   :  { %1711 = vmatpush.bf16.msra.mxu1 %v2645_v8  ;;  %1721 = vmatpush.bf16.msra.mxu2 %v2733_v26  ;;  %v2698_v8 = vld [vmem:[#allocation4 + $0x138] sm:$0xf0] }
 0x113   :  { %1697 = vmatpush.bf16.msrb.mxu0 %v2589_v17  ;;  %v3037_v17 = vld [vmem:[#allocation4 + $0xb4] sm:$0xf]  ;;  %v2701_v9 = vor.u32 %v3053_v7, %v2698_v8 }
 0x114   :  { %v2637_v20 = vor.u32 %v3037_v17, %v2634_v18  ;;  %v3051_v17 = vld [vmem:[#allocation4 + $0x124] sm:$0xf]  ;;  %v2690_v18 = vld [vmem:[#allocation4 + $0x128] sm:$0xf0] }
 0x115   :  { %v2693_v19 = vor.u32 %v3051_v17, %v2690_v18  ;;  %v384_v18 = vperm.slane %v3376_v49, 3 }
 0x116   :  { %1712 = vmatpush.bf16.msra.mxu1 %v2637_v20  ;;  %1722 = vmatpush.bf16.msra.mxu2 %v2725_v21  ;;  %v3047_v21 = vld [vmem:[#allocation4 + $0x104] sm:$0xf] }
 0x117   :  { %1698 = vmatpush.bf16.msrb.mxu0 %v2581_v27  ;;  %v3076_v27 = vld [vmem:[#allocation4 + $0x1e4] sm:$0xf0] }
 0x118   :  { %v2785_v30 = vor.u32 %v3076_v27, %v2784_v25  ;;  %v3066_v25 = vld [vmem:[#allocation4 + $0x194] sm:$0xf0] }
 0x119   :  { %v2745_v27 = vor.u32 %v3066_v25, %v2744_v24 }
 0x11a   :  { %1683 = vmatpush.bf16.msra.mxu3 %v2785_v30 }
 0x11b   :  { %1699 = vmatpush.bf16.msrb.mxu0 %v2573_v35 }
 0x11f   :  { %1700 = vmatpush.bf16.msrb.mxu0 %v2565_v45 }
 0x121   :  { %v3371_v22 = vpop.f32.mrf.mxu1 }
 0x123   :  { %1701 = vmatpush.bf16.msrb.mxu0 %v2557_v58  ;;  %v3055_v58 = vld [vmem:[#allocation4 + $0x144] sm:$0xf] }
 0x126   :  { %v1038_v34 = vpop.f32.mrf.mxu0 }
 0x127   :  { %v1039_v12 = vadd.f32 %v1038_v34, %v381_v61  ;;  %1702 = vmatpush.bf16.msrb.mxu0 %v2549_v6  ;;  %v2629_v34 = vor.u32 %v3035_v28, %v2626_v29  ;;  %v2706_v61 = vld [vmem:[#allocation4 + $0x148] sm:$0xf0]  ;;  %v2761_v6 = vor.u32 %v3070_v3, %v2760_v2  ;;  %v2682_v28 = vld [vmem:[#allocation4 + $0x118] sm:$0xf0]  ;;  %v3067_v3 = vld [vmem:[#allocation4 + $0x1a4] sm:$0xf] }
 0x128   :  { %v2709_v62 = vor.u32 %v3055_v58, %v2706_v61  ;;  %v3069_v61 = vld [vmem:[#allocation4 + $0x1b4] sm:$0xf] }
 0x129   :  { %v1053_v41 = vpop.f32.mrf.mxu1  ;;  %v1052_v33 = vadd.f32 %v3371_v22, %v1039_v12  ;;  %1713 = vmatpush.bf16.msra.mxu1 %v2629_v34  ;;  %v2714_v22 = vld [vmem:[#allocation4 + $0x158] sm:$0xf0]  ;;  %v3068_v12 = vld [vmem:[#allocation4 + $0x1a4] sm:$0xf0] }
 0x12a   :  { %v2777_v41 = vor.u32 %v3074_v38, %v2776_v37  ;;  %v2717_v48 = vor.u32 %v3057_v51, %v2714_v22  ;;  %v2753_v15 = vor.u32 %v3068_v12, %v2752_v11  ;;  %v2786_v51 = vld [vmem:[#allocation4 + $0x1e8] sm:$0xf0] }
 0x12b   :  { %v2789_v22 = vor.u32 %v3075_v43, %v2786_v51 }
 0x12c   :  { %1684 = vmatpush.bf16.msra.mxu3 %v2777_v41  ;;  %1723 = vmatpush.bf16.msra.mxu2 %v2717_v48  ;;  %v2778_v48 = vld [vmem:[#allocation4 + $0x1d8] sm:$0xf0] }
 0x12d   :  { %1714 = vmatpush.bf16.msra.mxu1 %v2621_v44 }
 0x12e   :  { %v1064_v53 = vpop.f32.mrf.mxu2  ;;  %v1040_v57 = vpop.f32.mrf.mxu0 }
 0x12f   :  { %v1065_v35 = vadd.f32 %v1064_v53, %v1052_v33  ;;  %v3072_v53 = vld [vmem:[#allocation4 + $0x1c4] sm:$0xf0]  ;;  %v2610_v57 = vld [vmem:[#allocation4 + $0x88] sm:$0xf0] }
 0x130   :  { %v2769_v55 = vor.u32 %v3072_v53, %v2768_v52  ;;  %v2613_v60 = vor.u32 %v3031_v56, %v2610_v57  ;;  %1724 = vmatpush.bf16.msra.mxu2 %v2709_v62  ;;  %v3064_v33 = vld [vmem:[#allocation4 + $0x184] sm:$0xf0]  ;;  %v2762_v62 = vld [vmem:[#allocation4 + $0x1b8] sm:$0xf0] }
 0x131   :  { %v3379_v1 = vpop.f32.mrf.mxu1  ;;  %v2737_v34 = vor.u32 %v3064_v33, %v2736_v32  ;;  %v2765_v2 = vor.u32 %v3069_v61, %v2762_v62  ;;  %v3085_v33 = vld [vmem:[%s3462_s7 + $0x30] sm:$0xff] }
 0x132   :  { %1685 = vmatpush.bf16.msra.mxu3 %v2769_v55  ;;  %1715 = vmatpush.bf16.msra.mxu1 %v2613_v60  ;;  %v2770_v55 = vld [vmem:[#allocation4 + $0x1c8] sm:$0xf0] }
 0x134   :  { %1725 = vmatpush.bf16.msra.mxu2 %v2701_v9  ;;  %v3065_v9 = vld [vmem:[#allocation4 + $0x194] sm:$0xf] }
 0x136   :  { %v1066_v13 = vpop.f32.mrf.mxu2  ;;  %1686 = vmatpush.bf16.msra.mxu3 %v2761_v6 }
 0x137   :  { %v1090_v63 = vpop.f32.mrf.mxu0 }
 0x138   :  { %v1091_v4 = vadd.f32 %v1090_v63, %v382_v50  ;;  %v3049_v63 = vld [vmem:[#allocation4 + $0x114] sm:$0xf]  ;;  %1726 = vmatpush.bf16.msra.mxu2 %v2693_v19 }
 0x139   :  { %v1105_v16 = vpop.f32.mrf.mxu1  ;;  %v2685_v30 = vor.u32 %v3049_v63, %v2682_v28 }
 0x13a   :  { %v1104_v13 = vadd.f32 %v3379_v1, %v1091_v4  ;;  %1687 = vmatpush.bf16.msra.mxu3 %v2753_v15  ;;  %v2754_v4 = vld [vmem:[#allocation4 + $0x1a8] sm:$0xf0] }
 0x13b   :  { %v2757_v7 = vor.u32 %v3067_v3, %v2754_v4 }
 0x13c   :  { %v1077_v36 = vpop.f32.mrf.mxu3  ;;  %1727 = vmatpush.bf16.msra.mxu2 %v2685_v30 }
 0x13d   :  { %v1078_v39 = vadd.f32 %v1077_v36, %v1065_v35  ;;  %v2674_v35 = vld [vmem:[#allocation4 + $0x108] sm:$0xf0]  ;;  %v3077_v36 = vld [vmem:[#allocation4 + $0x1f4] sm:$0xf] }
 0x13e   :  { %v1116_v40 = vpop.f32.mrf.mxu2  ;;  %1688 = vmatpush.bf16.msra.mxu3 %v2745_v27  ;;  %v2677_v38 = vor.u32 %v3047_v21, %v2674_v35  ;;  %v3083_v35 = vld [vmem:[%s3462_s7 + $0x20] sm:$0xff] }
 0x13f   :  { %vm1237_vm5 = vcmp.gt.f32.partialorder %v1078_v39, 0.0  ;;  %v1241_v45 = vmul.f32 0.01, %v1078_v39  ;;  %v1092_v46 = vpop.f32.mrf.mxu0  ;;  %v1117_v20 = vadd.f32 %v1116_v40, %v1104_v13  ;;  %v383_v40 = vperm.slane %v3376_v49, 2  ;;  %v3063_v13 = vld [vmem:[#allocation4 + $0x184] sm:$0xf] }
 0x140   :  { %1728 = vmatpush.bf16.msra.mxu2 %v2677_v38  ;;  %v3073_v46 = vld [vmem:[#allocation4 + $0x1d4] sm:$0xf]  ;;  %v3086_v49 = vld [vmem:[%s3462_s7 + $0x38] sm:$0xff] }
 0x141   :  { %v1245_v47 = vsel %vm1237_vm5, %v1078_v39, %v1241_v45  ;;  %v3383_v54 = vpop.f32.mrf.mxu1  ;;  %v2794_v39 = vld [vmem:[#allocation4 + $0x1f8] sm:$0xf0]  ;;  %v2781_v50 = vor.u32 %v3073_v46, %v2778_v48  ;;  %v3089_v46 = vld [vmem:[%s3462_s7 + $0x50] sm:$0xff] }
 0x142   :  { %v1249_v59 = vpack.c.bf16 %v1245_v47, %v1245_v47  ;;  %v2797_v41 = vor.u32 %v3077_v36, %v2794_v39  ;;  %1689 = vmatpush.bf16.msra.mxu3 %v2737_v34  ;;  %v3071_v47 = vld [vmem:[#allocation4 + $0x1c4] sm:$0xf]  ;;  %v3094_v36 = vld [vmem:[%s3462_s7 + $0x78] sm:$0xff]  ;;  %v3081_v39 = vld [vmem:[%s3462_s7 + $0x10] sm:$0xff] }
 0x143   :  { %v2773_v57 = vor.u32 %v3071_v47, %v2770_v55  ;;  %v1317_v47 = vld [vmem:[%s3461_s6] sm:$0x3] }
 0x144   :  { %v1079_v0 = vpop.f32.mrf.mxu3  ;;  %1651 = vmatmul.bf16.vlgmr.msra.gmra.mxu0 %v1249_v59  ;;  %v1319_v55 = vperm.slane %v1317_v47, 0  ;;  %v1320_v3 = vperm.slane %v1317_v47, 1 }
 0x145   :  { %1887 = vmatpush.bf16.msra.mxu0 %v3086_v49 }
 0x146   :  { %v1118_v5 = vpop.f32.mrf.mxu2  ;;  %1734 = vmatpush.bf16.msrb.mxu3 %v2797_v41  ;;  %v3080_v41 = vld [vmem:[%s3462_s7 + $0x8] sm:$0xff] }
 0x147   :  { %v1142_v10 = vpop.f32.mrf.mxu0 }
 0x148   :  { %v1143_v45 = vadd.f32 %v1142_v10, %v383_v40  ;;  %v2746_v10 = vld [vmem:[#allocation4 + $0x198] sm:$0xf0]  ;;  %v3093_v40 = vld [vmem:[%s3462_s7 + $0x70] sm:$0xff] }
 0x149   :  { %v1157_v14 = vpop.f32.mrf.mxu1  ;;  %v2749_v11 = vor.u32 %v3065_v9, %v2746_v10  ;;  %1888 = vmatpush.bf16.msra.mxu0 %v3085_v33 }
 0x14a   :  { %1735 = vmatpush.bf16.msrb.mxu3 %v2789_v22  ;;  %v1156_v52 = vadd.f32 %v3383_v54, %v1143_v45  ;;  %v2738_v14 = vld [vmem:[#allocation4 + $0x188] sm:$0xf0]  ;;  %v3091_v22 = vld [vmem:[%s3462_s7 + $0x60] sm:$0xff]  ;;  %v3090_v45 = vld [vmem:[%s3462_s7 + $0x58] sm:$0xff] }
 0x14b   :  { %v2741_v17 = vor.u32 %v3063_v13, %v2738_v14  ;;  %v3096_v13 = vld [vmem:[%s3464_s9 + $0x8] sm:$0xff]  ;;  %v3095_v14 = vld [vmem:[%s3464_s9] sm:$0xff] }
 0x14c   :  { %v1129_v23 = vpop.f32.mrf.mxu3 }
 0x14d   :  { %v1130_v26 = vadd.f32 %v1129_v23, %v1117_v20 }
 0x14e   :  { %v1168_v29 = vpop.f32.mrf.mxu2  ;;  %1736 = vmatpush.bf16.msrb.mxu3 %v2781_v50  ;;  %v3088_v50 = vld [vmem:[%s3462_s7 + $0x48] sm:$0xff] }
 0x14f   :  { %vm1238_vm6 = vcmp.gt.f32.partialorder %v1130_v26, 0.0  ;;  %v1242_v1 = vmul.f32 0.01, %v1130_v26  ;;  %v1144_v31 = vpop.f32.mrf.mxu0  ;;  %v1169_v53 = vadd.f32 %v1168_v29, %v1156_v52 }
 0x151   :  { %v1246_v16 = vsel %vm1238_vm6, %v1130_v26, %v1242_v1 }
 0x152   :  { %v1250_v37 = vpack.c.bf16 %v1246_v16, %v1246_v16  ;;  %1737 = vmatpush.bf16.msrb.mxu3 %v2773_v57  ;;  %v3084_v16 = vld [vmem:[%s3462_s7 + $0x28] sm:$0xff] }
 0x153   :  { %1889 = vmatpush.bf16.msra.mxu0 %v3084_v16 }
 0x154   :  { %v1131_v42 = vpop.f32.mrf.mxu3  ;;  %1664 = vmatmul.bf16.vlgmr.msrb.gmra.mxu1 %v1250_v37  ;;  %1703 = vmatmul.bf16.vlgmr.msrb.gmra.mxu0 %v1249_v59 }
 0x155   :  { %1900 = vmatpush.bf16.msrb.mxu1 %v3094_v36  ;;  %v3092_v42 = vld [vmem:[%s3462_s7 + $0x68] sm:$0xff] }
 0x156   :  { %v1170_v44 = vpop.f32.mrf.mxu2  ;;  %1738 = vmatpush.bf16.msrb.mxu3 %v2765_v2 }
 0x157   :  { %1890 = vmatpush.bf16.msra.mxu0 %v3083_v35  ;;  %v3079_v44 = vld [vmem:[%s3462_s7] sm:$0xff] }
 0x159   :  { %1901 = vmatpush.bf16.msrb.mxu1 %v3093_v40 }
 0x15a   :  { %1739 = vmatpush.bf16.msrb.mxu3 %v2757_v7 }
 0x15c   :  { %v1181_v56 = vpop.f32.mrf.mxu3 }
 0x15d   :  { %v1182_v58 = vadd.f32 %v1181_v56, %v1169_v53  ;;  %1902 = vmatpush.bf16.msrb.mxu1 %v3092_v42  ;;  %v3087_v53 = vld [vmem:[%s3462_s7 + $0x40] sm:$0xff] }
 0x15e   :  { %1740 = vmatpush.bf16.msrb.mxu3 %v2749_v11 }
 0x15f   :  { %vm1239_vm7 = vcmp.gt.f32.partialorder %v1182_v58, 0.0  ;;  %v1243_v60 = vmul.f32 0.01, %v1182_v58 }
 0x161   :  { %v1207_v59 = vpop.f32.mrf.mxu1  ;;  %v1247_v0 = vsel %vm1239_vm7, %v1182_v58, %v1243_v60  ;;  %1903 = vmatpush.bf16.msrb.mxu1 %v3091_v22 }
 0x162   :  { %v1251_v5 = vpack.c.bf16 %v1247_v0, %v1247_v0  ;;  %1741 = vmatpush.bf16.msrb.mxu3 %v2741_v17 }
 0x164   :  { %1716 = vmatmul.bf16.vlgmr.msra.gmra.mxu1 %v1250_v37  ;;  %v1183_v54 = vpop.f32.mrf.mxu3  ;;  %1677 = vmatmul.bf16.vlgmr.msrb.gmra.mxu2 %v1251_v5  ;;  %v3082_v37 = vld [vmem:[%s3462_s7 + $0x18] sm:$0xff] }
 0x165   :  { %1891 = vmatpush.bf16.msra.mxu0 %v3082_v37  ;;  %1904 = vmatpush.bf16.msrb.mxu1 %v3090_v45 }
 0x166   :  { %1947 = vmatpush.bf16.msrb.mxu2 %v3096_v13 }
 0x167   :  { %v1194_v6 = vpop.f32.mrf.mxu0 }
 0x168   :  { %v1195_v20 = vadd.f32 %v1194_v6, %v384_v18  ;;  %v3103_v18 = vld [vmem:[%s3463_s8] ss:$0 sm:$0xff] }
 0x169   :  { %v1209_v8 = vpop.f32.mrf.mxu1  ;;  %1892 = vmatpush.bf16.msra.mxu0 %v3081_v39  ;;  %1905 = vmatpush.bf16.msrb.mxu1 %v3089_v46 }
 0x16a   :  { %v1208_v23 = vadd.f32 %v1207_v59, %v1195_v20  ;;  %1948 = vmatpush.bf16.msrb.mxu2 %v3095_v14 }
 0x16d   :  { %1893 = vmatpush.bf16.msra.mxu0 %v3080_v41  ;;  %1906 = vmatpush.bf16.msrb.mxu1 %v3088_v50 }
 0x16e   :  { %v1220_v12 = vpop.f32.mrf.mxu2 }
 0x16f   :  { %v1196_v15 = vpop.f32.mrf.mxu0  ;;  %v1221_v24 = vadd.f32 %v1220_v12, %v1208_v23 }
 0x171   :  { %1894 = vmatpush.bf16.msra.mxu0 %v3079_v44  ;;  %1907 = vmatpush.bf16.msrb.mxu1 %v3087_v53 }
 0x174   :  { %1729 = vmatmul.bf16.vlgmr.msra.gmra.mxu2 %v1251_v5 }
 0x176   :  { %v1222_v19 = vpop.f32.mrf.mxu2 }
 0x17c   :  { %v1233_v25 = vpop.f32.mrf.mxu3 }
 0x17d   :  { %v1234_v63 = vadd.f32 %v1233_v25, %v1221_v24 }
 0x17f   :  { %vm1240_vm8 = vcmp.gt.f32.partialorder %v1234_v63, 0.0  ;;  %v1244_v26 = vmul.f32 0.01, %v1234_v63 }
 0x181   :  { %v1248_v27 = vsel %vm1240_vm8, %v1234_v63, %v1244_v26 }
 0x182   :  { %v1252_v28 = vpack.c.bf16 %v1248_v27, %v1248_v27  ;;  %v3104_v27 = vld [vmem:[%s3465_s10] ss:$0 sm:$0xff] }
 0x184   :  { %v1235_v29 = vpop.f32.mrf.mxu3  ;;  %1690 = vmatmul.bf16.vlgmr.msra.gmra.mxu3 %v1252_v28 }
 0x194   :  { %1742 = vmatmul.bf16.vlgmr.msrb.gmra.mxu3 %v1252_v28 }
 0x1c1   :  { %v1652_v30 = vpop.f32.mrf.mxu0 }
 0x1c2   :  { %v1653_v56 = vadd.f32 %v1652_v30, %v1319_v55 }
 0x1c9   :  { %v1654_v1 = vpop.f32.mrf.mxu0 }
 0x1d1   :  { %v1665_v31 = vpop.f32.mrf.mxu1  ;;  %v1704_v32 = vpop.f32.mrf.mxu0 }
 0x1d2   :  { %v1666_v58 = vadd.f32 %v1665_v31, %v1653_v56  ;;  %v1705_v5 = vadd.f32 %v1704_v32, %v1320_v3 }
 0x1d9   :  { %v1667_v34 = vpop.f32.mrf.mxu1  ;;  %v1706_v21 = vpop.f32.mrf.mxu0 }
 0x1e1   :  { %v1717_v38 = vpop.f32.mrf.mxu1 }
 0x1e2   :  { %v1718_v6 = vadd.f32 %v1717_v38, %v1705_v5 }
 0x1e7   :  { %v1678_v43 = vpop.f32.mrf.mxu2 }
 0x1e8   :  { %v1679_v59 = vadd.f32 %v1678_v43, %v1666_v58 }
 0x1e9   :  { %v1719_v51 = vpop.f32.mrf.mxu1 }
 0x1ef   :  { %v1680_v48 = vpop.f32.mrf.mxu2 }
 0x1f7   :  { %v1730_v52 = vpop.f32.mrf.mxu2 }
 0x1f8   :  { %v1731_v54 = vadd.f32 %v1730_v52, %v1718_v6 }
 0x1ff   :  { %v1732_v57 = vpop.f32.mrf.mxu2 }
 0x207   :  { %v1691_v60 = vpop.f32.mrf.mxu3 }
 0x208   :  { %v1692_v61 = vadd.f32 %v1691_v60, %v1679_v59 }
 0x20a   :  { %vm1747_vm9 = vcmp.gt.f32.partialorder %v1692_v61, 0.0  ;;  %v1749_v62 = vmul.f32 0.01, %v1692_v61 }
 0x20c   :  { %v1751_v0 = vsel %vm1747_vm9, %v1692_v61, %v1749_v62 }
 0x20d   :  { %v1753_v2 = vpack.c.bf16 %v1751_v0, %v1751_v0 }
 0x20f   :  { %v1693_v4 = vpop.f32.mrf.mxu3  ;;  %1895 = vmatmul.bf16.vlgmr.msra.gmra.mxu0 %v1753_v2 }
 0x217   :  { %v1743_v7 = vpop.f32.mrf.mxu3 }
 0x218   :  { %v1744_v8 = vadd.f32 %v1743_v7, %v1731_v54 }
 0x21a   :  { %vm1748_vm10 = vcmp.gt.f32.partialorder %v1744_v8, 0.0  ;;  %v1750_v9 = vmul.f32 0.01, %v1744_v8 }
 0x21c   :  { %v1752_v10 = vsel %vm1748_vm10, %v1744_v8, %v1750_v9 }
 0x21d   :  { %v1754_v11 = vpack.c.bf16 %v1752_v10, %v1752_v10 }
 0x21f   :  { %v1745_v12 = vpop.f32.mrf.mxu3  ;;  %1908 = vmatmul.bf16.vlgmr.msrb.gmra.mxu1 %v1754_v11 }
 0x28c   :  { %v1896_v15 = vpop.f32.mrf.mxu0 }
 0x28d   :  { %v1897_v19 = vadd.f32 %v3103_v18, %v1896_v15 }
 0x294   :  { %v1898_v17 = vpop.f32.mrf.mxu0 }
 0x29c   :  { %v1909_v20 = vpop.f32.mrf.mxu1 }
 0x29d   :  { %v1910_v23 = vadd.f32 %v1909_v20, %v1897_v19 }
 0x29f   :  { %vm1913_vm11 = vcmp.gt.f32.partialorder %v1910_v23, 0.0  ;;  %v1914_v24 = vmul.f32 0.01, %v1910_v23 }
 0x2a1   :  { %v1915_v25 = vsel %vm1913_vm11, %v1910_v23, %v1914_v24 }
 0x2a2   :  { %v1916_v63 = vpack.c.bf16 %v1915_v25, %v1915_v25 }
 0x2a4   :  { %v1911_v26 = vpop.f32.mrf.mxu1  ;;  %2870 = vmatmul.msk.bf16.vlgmr.msrb.gmra.mxu2 %vm1937_vm12, %v1916_v63 }
 0x327   :  { %v1950_v28 = vpop.f32.mrf.mxu2 }
 0x328   :  { %v1951_v29 = vadd.f32 %v3104_v27, %v1950_v28 }
 0x32a   :  { %v1954_v30 = vpack.c.bf16 %v1951_v29, %v1951_v29 }
 0x32c   :  { %1955 = vst [vmem:[%s3466_s11] sm:$0xf] %v1954_v30 }
 0x32f   :  { %v1952_v1 = vpop.f32.mrf.mxu2 }
 0x330   :  { %1960 = vsyncpa [#allocation3], 1 }
 0x331   :  { %1961 = vsyncpa [#allocation5], 1 }

</bundles_post_ra>
